<compile_context>
chip_gen: v7x
topology: tpu7x:2x2x1
jax: 0.10.0
libtpu: 0.0.40
codegen_flags: <defaults>
</compile_context>

<pallas_src>
import math
import functools

import jax
import jax.numpy as jnp
from jax.experimental import pallas as pl
from jax.experimental.pallas import tpu as pltpu


MASK_VALUE = -1e30                      # finite sentinel (safe for tiled variants too)
VMEM_LIMIT_BYTES = 32 * 1024 * 1024     # explicit scoped-VMEM cap; valid on v5e/v6e/v7x


# ----------------------------------------------------------------------------
# Shared math helpers (used both in-kernel and in the pure-JAX reference)
# ----------------------------------------------------------------------------

def _layernorm(v, g, b, eps=1e-5):
    # two-pass (centered) variance: matches PyTorch LayerNorm numerics
    mu = jnp.mean(v, axis=-1, keepdims=True)
    c = v - mu
    var = jnp.mean(c * c, axis=-1, keepdims=True)
    return c * jax.lax.rsqrt(var + eps) * g + b


def _additive_causal_mask(S):
    keep = jnp.tril(jnp.ones((S, S), dtype=bool))
    return jnp.where(keep, jnp.float32(0.0), jnp.float32(MASK_VALUE))


# ----------------------------------------------------------------------------
# Fused decoder stack: one pallas_call, grid over layers, out_ref = layer carry
# ----------------------------------------------------------------------------

def run_decoder_stack(x, pe, sp, *, n_heads, d_k, d_v):
    S, D = x.shape
    L = sp["wqkv"].shape[0]
    d_ff = sp["w1"].shape[2]
    Hdk = n_heads * d_k

    mask = _additive_causal_mask(S)      # hoisted: built once, constant index_map

    def kernel(x_ref, pe_ref, mask_ref, wqkv_ref, wp_ref, bp_ref,
               ln1g_ref, ln1b_ref, w1_ref, b1_ref, w2_ref, b2_ref,
               ln2g_ref, ln2b_ref, lnfg_ref, lnfb_ref, out_ref):
        layer = pl.program_id(0)
        last = pl.num_programs(0) - 1

        @pl.when(layer == 0)
        def _():
            out_ref[...] = x_ref[...] + pe_ref[...]   # fused x + pe prologue

        xa = out_ref[...]                             # (S, D) f32, VMEM-resident carry
        xb = xa.astype(jnp.bfloat16)
        amask = mask_ref[...]                         # (S, S) additive causal mask

        # --- fused QKV projection (one wide MXU pass) --------------------------
        qkv = jnp.dot(xb, wqkv_ref[...], preferred_element_type=jnp.float32)
        wp = wp_ref[...]                              # (H*dv, D) bf16

        # --- per-head masked attention, fully unrolled (static 2-D slices) -----
        # head merge is folded into the projection: attn = sum_h z_h @ Wp_h
        attn = jnp.zeros((S, D), jnp.float32)
        for h in range(n_heads):
            q_h = qkv[:, h * d_k:(h + 1) * d_k].astype(jnp.bfloat16)            # (S,dk)
            k_h = qkv[:, Hdk + h * d_k:Hdk + (h + 1) * d_k].astype(jnp.bfloat16)
            v_h = qkv[:, 2 * Hdk + h * d_v:2 * Hdk + (h + 1) * d_v].astype(jnp.bfloat16)

            s_h = jnp.einsum('qd,kd->qk', q_h, k_h,
                             preferred_element_type=jnp.float32)                # (S,S)
            s_h = s_h + amask
            m_h = jnp.max(s_h, axis=-1, keepdims=True)
            e_h = jnp.exp(s_h - m_h)                                            # f32, EUP

            # flash-style epilogue normalization: matmul first, scale the small result
            z_h = jnp.dot(e_h.astype(jnp.bfloat16), v_h,
                          preferred_element_type=jnp.float32)                   # (S,dv)
            z_h = z_h * pl.reciprocal(jnp.sum(e_h, axis=-1, keepdims=True), approx=True)

            attn = attn + jnp.dot(z_h.astype(jnp.bfloat16),
                                  wp[h * d_v:(h + 1) * d_v, :],
                                  preferred_element_type=jnp.float32)           # (S,D)
        attn = attn + bp_ref[...]

        # --- residual + LN1, FFN, residual + LN2 --------------------------------
        z1 = _layernorm(xa + attn, ln1g_ref[...], ln1b_ref[...])

        f = jnp.dot(z1.astype(jnp.bfloat16), w1_ref[...],
                    preferred_element_type=jnp.float32) + b1_ref[...]
        f = jnp.maximum(f, 0.0)
        f = jnp.dot(f.astype(jnp.bfloat16), w2_ref[...],
                    preferred_element_type=jnp.float32) + b2_ref[...]

        z2 = _layernorm(z1 + f, ln2g_ref[...], ln2b_ref[...])

        @pl.when(layer < last)
        def _():
            out_ref[...] = z2                         # carry to next layer (stays in VMEM)

        @pl.when(layer == last)
        def _():
            # final model LayerNorm applied once here (hoisted out of the vocab head)
            out_ref[...] = _layernorm(z2, lnfg_ref[...], lnfb_ref[...])

    w_names = ["wqkv", "wp", "bp", "ln1g", "ln1b", "w1", "b1", "w2", "b2",
               "ln2g", "ln2b"]
    w_args = [sp[n] for n in w_names]

    in_specs = ([pl.BlockSpec((S, D), lambda l: (0, 0)),          # x
                 pl.BlockSpec((S, D), lambda l: (0, 0)),          # pe
                 pl.BlockSpec((S, S), lambda l: (0, 0))] +        # additive causal mask
                [pl.BlockSpec((None,) + a.shape[1:], lambda l: (l, 0, 0))
                 for a in w_args] +                               # per-layer weight stream
                [pl.BlockSpec((1, D), lambda l: (0, 0)),          # final-LN gamma
                 pl.BlockSpec((1, D), lambda l: (0, 0))])         # final-LN beta

    flops_per_layer = (2 * S * D * (n_heads * (2 * d_k + d_v))    # fused QKV
                       + 2 * n_heads * S * S * d_k                # scores
                       + 2 * n_heads * S * S * d_v                # AV
                       + 2 * S * n_heads * d_v * D                # output projection
                       + 4 * S * D * d_ff)                        # FFN
    weight_bytes = (sum(int(a.size) * a.dtype.itemsize for a in w_args)
                    + 2 * D * 4)
    cost = pl.CostEstimate(flops=L * flops_per_layer,
                           transcendentals=L * n_heads * S * S,
                           bytes_accessed=(2 * S * D + S * S) * 4 + weight_bytes
                                          + S * D * 4)

    return pl.pallas_call(
        kernel,
        out_shape=jax.ShapeDtypeStruct((S, D), jnp.float32),
        grid=(L,),
        in_specs=in_specs,
        out_specs=pl.BlockSpec((S, D), lambda l: (0, 0)),
        compiler_params=pltpu.CompilerParams(
            dimension_semantics=("arbitrary",),
            vmem_limit_bytes=VMEM_LIMIT_BYTES),
        cost_estimate=cost,
    )(x, pe, mask, *w_args, sp["lnfg"], sp["lnfb"])


# ----------------------------------------------------------------------------
# Head: pure GEMM + bias (final LayerNorm already applied in the stack epilogue),
# tiled over the vocab dimension with the largest lane-dense tile that divides it.
# ----------------------------------------------------------------------------

def _pick_vocab_tile(n_vocab, cap=2048):
    if n_vocab % 128 != 0:
        return n_vocab                      # full-dim block (allowed by the (8,128) rule)
    tv = 128
    for c in range(128, min(cap, n_vocab) + 1, 128):
        if n_vocab % c == 0:
            tv = c
    return tv


def run_head(x, hp, n_vocab):
    S, D = x.shape
    tv = _pick_vocab_tile(n_vocab)
    grid = (n_vocab // tv,)

    def kernel(x_ref, w_ref, b_ref, out_ref):
        out_ref[...] = (jnp.dot(x_ref[...].astype(jnp.bfloat16), w_ref[...],
                                preferred_element_type=jnp.float32)
                        + b_ref[...])

    cost = pl.CostEstimate(flops=2 * S * D * n_vocab,
                           transcendentals=0,
                           bytes_accessed=(S * D * 4 + D * n_vocab * 2
                                           + n_vocab * 4 + S * n_vocab * 4))

    return pl.pallas_call(
        kernel,
        out_shape=jax.ShapeDtypeStruct((S, n_vocab), jnp.float32),
        grid=grid,
        in_specs=[
            pl.BlockSpec((S, D), lambda j: (0, 0)),
            pl.BlockSpec((D, tv), lambda j: (0, j)),
            pl.BlockSpec((1, tv), lambda j: (0, j)),
        ],
        out_specs=pl.BlockSpec((S, tv), lambda j: (0, j)),
        compiler_params=pltpu.CompilerParams(
            dimension_semantics=("parallel",),
            vmem_limit_bytes=VMEM_LIMIT_BYTES),
        cost_estimate=cost,
    )(x, hp["w"], hp["b"])


# ----------------------------------------------------------------------------
# Parameter init (shape-faithful to the PyTorch module) + packing
# ----------------------------------------------------------------------------

class _KeyGen:
    def __init__(self, key):
        self._key = key

    def __call__(self):
        self._key, sub = jax.random.split(self._key)
        return sub


def init_params(key, *, n_vocab, n_blocks, n_heads, d_model, d_k, d_v, d_ff,
                n_embeddings_max):
    nk = _KeyGen(key)

    def xavier_t(k, fan_in, fan_out):
        bound = math.sqrt(6.0 / (fan_in + fan_out))
        return jax.random.uniform(k, (fan_in, fan_out), jnp.float32, -bound, bound)

    def linear_t(k, fan_in, fan_out):
        bound = 1.0 / math.sqrt(fan_in)
        kw, kb = jax.random.split(k)
        w = jax.random.uniform(kw, (fan_in, fan_out), jnp.float32, -bound, bound)
        b = jax.random.uniform(kb, (1, fan_out), jnp.float32, -bound, bound)
        return w, b

    params = {"embedding": jax.random.normal(nk(), (n_vocab, d_model), jnp.float32)}

    # positional encoding, exactly as the reference __init__ writes it
    # (requires n_embeddings_max == d_model for the division broadcast).
    positions = jnp.arange(n_embeddings_max, dtype=jnp.float32)[:, None]
    dimensions = jnp.arange(d_model, dtype=jnp.float32)[:, None]
    frequencies = jnp.power(10000.0, 2.0 / d_model * dimensions)
    ratio = positions / frequencies
    pe = jnp.zeros((n_embeddings_max, d_model), jnp.float32)
    pe = pe.at[:, 0::2].set(jnp.sin(ratio))
    pe = pe.at[:, 1::2].set(jnp.cos(ratio))
    params["pe"] = pe

    blocks = []
    for _ in range(n_blocks):
        b = {}
        b["wq"] = jnp.concatenate([xavier_t(nk(), d_model, d_k) for _ in range(n_heads)], axis=1)
        b["wk"] = jnp.concatenate([xavier_t(nk(), d_model, d_k) for _ in range(n_heads)], axis=1)
        b["wv"] = jnp.concatenate([xavier_t(nk(), d_model, d_v) for _ in range(n_heads)], axis=1)
        b["wp"], b["bp"] = linear_t(nk(), n_heads * d_v, d_model)
        b["ln1g"] = jnp.ones((1, d_model), jnp.float32)
        b["ln1b"] = jnp.zeros((1, d_model), jnp.float32)
        b["w1"], b["b1"] = linear_t(nk(), d_model, d_ff)
        b["w2"], b["b2"] = linear_t(nk(), d_ff, d_model)
        b["ln2g"] = jnp.ones((1, d_model), jnp.float32)
        b["ln2b"] = jnp.zeros((1, d_model), jnp.float32)
        blocks.append(b)
    params["blocks"] = blocks

    head = {"lng": jnp.ones((1, d_model), jnp.float32),
            "lnb": jnp.zeros((1, d_model), jnp.float32)}
    head["w"], head["b"] = linear_t(nk(), d_model, n_vocab)
    params["head"] = head
    return params


def pack_params(params, *, d_k):
    """Stack per-layer weights along a leading layer axis; fuse Wq|Wk|Wv into one
    QKV matrix (1/sqrt(d_k) folded into the Wq slice); cast matmul operands to bf16
    (f32 accumulation happens in-kernel). Final LN params go to the stack epilogue."""
    blocks = params["blocks"]
    scale = 1.0 / math.sqrt(d_k)

    def stack(name):
        return jnp.stack([b[name] for b in blocks], axis=0)

    wqkv = jnp.stack(
        [jnp.concatenate([b["wq"] * scale, b["wk"], b["wv"]], axis=1) for b in blocks],
        axis=0).astype(jnp.bfloat16)

    stacked = {
        "wqkv": wqkv,
        "wp": stack("wp").astype(jnp.bfloat16),
        "w1": stack("w1").astype(jnp.bfloat16),
        "w2": stack("w2").astype(jnp.bfloat16),
        # biases / LayerNorm params stay f32 (added to f32 accumulators)
        "bp": stack("bp"), "b1": stack("b1"), "b2": stack("b2"),
        "ln1g": stack("ln1g"), "ln1b": stack("ln1b"),
        "ln2g": stack("ln2g"), "ln2b": stack("ln2b"),
        "lnfg": params["head"]["lng"], "lnfb": params["head"]["lnb"],
    }
    head = {"w": params["head"]["w"].astype(jnp.bfloat16), "b": params["head"]["b"]}
    return {"stack": stacked, "head": head}


# ----------------------------------------------------------------------------
# Forward (Pallas) and pure-JAX reference
# ----------------------------------------------------------------------------

def xformer_decoder_forward(tokens, embedding, pe, packed, *,
                            n_vocab, n_heads, d_k, d_v):
    """tokens: (seq_len,) int32 -> logits (seq_len, n_vocab) float32."""
    x = embedding[tokens]                  # embedding gather: plain-JAX glue
    z = run_decoder_stack(x, pe, packed["stack"], n_heads=n_heads, d_k=d_k, d_v=d_v)
    logits = run_head(z, packed["head"], n_vocab)
    return logits
    # TODO(synk): cross_entropy loss path (targets != None) left to plain-JAX glue.


def reference_forward(tokens, embedding, pe, packed, *, n_heads, d_k, d_v):
    """Pure-JAX mirror of the kernel math (same bf16-operand / f32-accumulate split)."""
    sp, hp = packed["stack"], packed["head"]
    z = embedding[tokens] + pe
    S, D = z.shape
    Hdk = n_heads * d_k
    mask = _additive_causal_mask(S)
    L = sp["wqkv"].shape[0]
    for l in range(L):
        xb = z.astype(jnp.bfloat16)
        qkv = jnp.dot(xb, sp["wqkv"][l], preferred_element_type=jnp.float32)
        wp = sp["wp"][l]
        attn = jnp.zeros((S, D), jnp.float32)
        for h in range(n_heads):
            q_h = qkv[:, h * d_k:(h + 1) * d_k].astype(jnp.bfloat16)
            k_h = qkv[:, Hdk + h * d_k:Hdk + (h + 1) * d_k].astype(jnp.bfloat16)
            v_h = qkv[:, 2 * Hdk + h * d_v:2 * Hdk + (h + 1) * d_v].astype(jnp.bfloat16)
            s_h = jnp.einsum('qd,kd->qk', q_h, k_h,
                             preferred_element_type=jnp.float32) + mask
            w_h = jax.nn.softmax(s_h, axis=-1)
            z_h = jnp.dot(w_h.astype(jnp.bfloat16), v_h, preferred_element_type=jnp.float32)
            attn = attn + jnp.dot(z_h.astype(jnp.bfloat16), wp[h * d_v:(h + 1) * d_v, :],
                                  preferred_element_type=jnp.float32)
        attn = attn + sp["bp"][l]
        z1 = _layernorm(z + attn, sp["ln1g"][l], sp["ln1b"][l])
        f = jnp.maximum(jnp.dot(z1.astype(jnp.bfloat16), sp["w1"][l],
                                preferred_element_type=jnp.float32) + sp["b1"][l], 0.0)
        f = jnp.dot(f.astype(jnp.bfloat16), sp["w2"][l],
                    preferred_element_type=jnp.float32) + sp["b2"][l]
        z = _layernorm(z1 + f, sp["ln2g"][l], sp["ln2b"][l])
    z = _layernorm(z, sp["lnfg"], sp["lnfb"])
    return jnp.dot(z.astype(jnp.bfloat16), hp["w"],
                   preferred_element_type=jnp.float32) + hp["b"]


# ----------------------------------------------------------------------------
# Demo
# ----------------------------------------------------------------------------

if __name__ == "__main__":
    n_vocab = 256                 # multiple of 128 -> lane-dense head output tiles
    n_blocks = 2
    n_heads = 4
    d_model = 32
    d_k = 8
    d_v = 8
    d_ff = 64
    n_embeddings_max = 32
    seq_len = n_embeddings_max

    assert d_model % n_heads == 0, "d_model must be divisible by n_heads"
    # the reference PE construction / `X + pe` only broadcast correctly under these
    # conditions; fail loudly for any other shape combination.
    assert n_embeddings_max == d_model, "reference PE needs n_embeddings_max == d_model"
    assert seq_len == n_embeddings_max, "reference `X + pe` needs seq_len == n_embeddings_max"

    key = jax.random.PRNGKey(0)
    kp, kt = jax.random.split(key)
    params = init_params(kp, n_vocab=n_vocab, n_blocks=n_blocks, n_heads=n_heads,
                         d_model=d_model, d_k=d_k, d_v=d_v, d_ff=d_ff,
                         n_embeddings_max=n_embeddings_max)
    packed = pack_params(params, d_k=d_k)
    tokens = jax.random.randint(kt, (seq_len,), 0, n_vocab, dtype=jnp.int32)

    fwd = jax.jit(functools.partial(xformer_decoder_forward, n_vocab=n_vocab,
                                    n_heads=n_heads, d_k=d_k, d_v=d_v))
    logits = jax.block_until_ready(fwd(tokens, params["embedding"], params["pe"], packed))

    assert logits.shape == (seq_len, n_vocab), logits.shape
    assert bool(jnp.all(jnp.isfinite(logits)))

    # tolerance-asserted reference comparison (bf16-class tolerance: bf16 operands,
    # approx reciprocal in the softmax epilogue, scale folded into a bf16 Wq)
    ref = reference_forward(tokens, params["embedding"], params["pe"], packed,
                            n_heads=n_heads, d_k=d_k, d_v=d_v)
    assert bool(jnp.max(jnp.abs(logits - ref)) < 1e-1)

    print("KERNEL_OK")
</pallas_src>

<mosaic_0001>
module attributes {stable_mosaic.version = 11 : i64} {
  func.func @kernel(%arg0: i32, %arg1: memref<32x32xf32, #tpu.memory_space<vmem>>, %arg2: memref<32x256xbf16, #tpu.memory_space<vmem>>, %arg3: memref<1x256xf32, #tpu.memory_space<vmem>>, %arg4: memref<32x256xf32, #tpu.memory_space<vmem>>) attributes {dimension_semantics = [#tpu.dimension_semantics<parallel>], iteration_bounds = array<i64: 1>, scalar_prefetch = 0 : i64, scratch_operands = 0 : i64, tpu.core_type = #tpu.core_type<tc>, window_params = [{pipeline_mode = #tpu.pipeline_mode<synchronous>, transform_indices = @transform_0, window_bounds = array<i64: 32, 32>}, {transform_indices = @transform_1, window_bounds = array<i64: 32, 256>}, {transform_indices = @transform_2, window_bounds = array<i64: 1, 256>}, {transform_indices = @transform_3, window_bounds = array<i64: 32, 256>}]} {
    %c0 = arith.constant 0 : index
    %c0_0 = arith.constant 0 : index
    %0 = vector.load %arg1[%c0, %c0_0] : memref<32x32xf32, #tpu.memory_space<vmem>>, vector<32x32xf32>
    %1 = arith.truncf %0 : vector<32x32xf32> to vector<32x32xbf16>
    %c0_1 = arith.constant 0 : index
    %c0_2 = arith.constant 0 : index
    %2 = vector.load %arg2[%c0_1, %c0_2] : memref<32x256xbf16, #tpu.memory_space<vmem>>, vector<32x256xbf16>
    %cst = arith.constant dense<0.000000e+00> : vector<32x256xf32>
    %3 = tpu.matmul %1, %2, %cst {dimension_numbers = #tpu.dot_dimension_numbers<[1], [0], [0], [1], [0, 0, 1, 1], [], []>} : vector<32x32xbf16>, vector<32x256xbf16>, vector<32x256xf32> -> vector<32x256xf32>
    %c0_3 = arith.constant 0 : index
    %c0_4 = arith.constant 0 : index
    %4 = vector.load %arg3[%c0_3, %c0_4] : memref<1x256xf32, #tpu.memory_space<vmem>>, vector<1x256xf32>
    %5 = vector.broadcast %4 : vector<1x256xf32> to vector<32x256xf32>
    %6 = arith.addf %3, %5 : vector<32x256xf32>
    %c0_5 = arith.constant 0 : index
    %c0_6 = arith.constant 0 : index
    %7 = vector.load %arg4[%c0_5, %c0_6] : memref<32x256xf32, #tpu.memory_space<vmem>>, vector<32x256xf32>
    tpu.vector_store %arg4[%c0_5, %c0_6], %6 {strides = array<i32>} : memref<32x256xf32, #tpu.memory_space<vmem>>, vector<32x256xf32>,
    return
  }
  func.func @transform_0(%arg0: i32) -> (i32, i32) {
    %c0_i32 = arith.constant 0 : i32
    %c0_i32_0 = arith.constant 0 : i32
    %c0_i32_1 = arith.constant 0 : i32
    return %c0_i32, %c0_i32_0 : i32, i32
  }
  func.func @transform_1(%arg0: i32) -> (i32, i32) {
    %c0_i32 = arith.constant 0 : i32
    %c0_i32_0 = arith.constant 0 : i32
    return %c0_i32, %arg0 : i32, i32
  }
  func.func @transform_2(%arg0: i32) -> (i32, i32) {
    %c0_i32 = arith.constant 0 : i32
    %c0_i32_0 = arith.constant 0 : i32
    return %c0_i32, %arg0 : i32, i32
  }
  func.func @transform_3(%arg0: i32) -> (i32, i32) {
    %c0_i32 = arith.constant 0 : i32
    %c0_i32_0 = arith.constant 0 : i32
    return %c0_i32, %arg0 : i32, i32
  }
}

module attributes {stable_mosaic.version = 11 : i64} {
  func.func @kernel(%arg0: i32, %arg1: memref<32x32xf32, #tpu.memory_space<vmem>>, %arg2: memref<32x32xf32, #tpu.memory_space<vmem>>, %arg3: memref<32x32xf32, #tpu.memory_space<vmem>>, %arg4: memref<1x32x96xbf16, #tpu.memory_space<vmem>>, %arg5: memref<1x32x32xbf16, #tpu.memory_space<vmem>>, %arg6: memref<1x1x32xf32, #tpu.memory_space<vmem>>, %arg7: memref<1x1x32xf32, #tpu.memory_space<vmem>>, %arg8: memref<1x1x32xf32, #tpu.memory_space<vmem>>, %arg9: memref<1x32x64xbf16, #tpu.memory_space<vmem>>, %arg10: memref<1x1x64xf32, #tpu.memory_space<vmem>>, %arg11: memref<1x64x32xbf16, #tpu.memory_space<vmem>>, %arg12: memref<1x1x32xf32, #tpu.memory_space<vmem>>, %arg13: memref<1x1x32xf32, #tpu.memory_space<vmem>>, %arg14: memref<1x1x32xf32, #tpu.memory_space<vmem>>, %arg15: memref<1x32xf32, #tpu.memory_space<vmem>>, %arg16: memref<1x32xf32, #tpu.memory_space<vmem>>, %arg17: memref<32x32xf32, #tpu.memory_space<vmem>>) attributes {dimension_semantics = [#tpu.dimension_semantics<arbitrary>], iteration_bounds = array<i64: 2>, scalar_prefetch = 0 : i64, scratch_operands = 0 : i64, tpu.core_type = #tpu.core_type<tc>, window_params = [{pipeline_mode = #tpu.pipeline_mode<synchronous>, transform_indices = @transform_0, window_bounds = array<i64: 32, 32>}, {pipeline_mode = #tpu.pipeline_mode<synchronous>, transform_indices = @transform_1, window_bounds = array<i64: 32, 32>}, {pipeline_mode = #tpu.pipeline_mode<synchronous>, transform_indices = @transform_2, window_bounds = array<i64: 32, 32>}, {transform_indices = @transform_3, window_bounds = array<i64: 1, 32, 96>}, {transform_indices = @transform_4, window_bounds = array<i64: 1, 32, 32>}, {transform_indices = @transform_5, window_bounds = array<i64: 1, 1, 32>}, {transform_indices = @transform_6, window_bounds = array<i64: 1, 1, 32>}, {transform_indices = @transform_7, window_bounds = array<i64: 1, 1, 32>}, {transform_indices = @transform_8, window_bounds = array<i64: 1, 32, 64>}, {transform_indices = @transform_9, window_bounds = array<i64: 1, 1, 64>}, {transform_indices = @transform_10, window_bounds = array<i64: 1, 64, 32>}, {transform_indices = @transform_11, window_bounds = array<i64: 1, 1, 32>}, {transform_indices = @transform_12, window_bounds = array<i64: 1, 1, 32>}, {transform_indices = @transform_13, window_bounds = array<i64: 1, 1, 32>}, {pipeline_mode = #tpu.pipeline_mode<synchronous>, transform_indices = @transform_14, window_bounds = array<i64: 1, 32>}, {pipeline_mode = #tpu.pipeline_mode<synchronous>, transform_indices = @transform_15, window_bounds = array<i64: 1, 32>}, {pipeline_mode = #tpu.pipeline_mode<synchronous>, transform_indices = @transform_16, window_bounds = array<i64: 32, 32>}]} {
    %c0_i32 = arith.constant 0 : i32
    %0 = arith.cmpi eq, %arg0, %c0_i32 : i32
    %1 = arith.extui %0 : i1 to i32
    %c0_i32_0 = arith.constant 0 : i32
    %2 = arith.cmpi ne, %1, %c0_i32_0 : i32
    scf.if %2 {
      %c0_74 = arith.constant 0 : index
      %c0_75 = arith.constant 0 : index
      %186 = vector.load %arg1[%c0_74, %c0_75] : memref<32x32xf32, #tpu.memory_space<vmem>>, vector<32x32xf32>
      %c0_76 = arith.constant 0 : index
      %c0_77 = arith.constant 0 : index
      %187 = vector.load %arg2[%c0_76, %c0_77] : memref<32x32xf32, #tpu.memory_space<vmem>>, vector<32x32xf32>
      %188 = arith.addf %186, %187 : vector<32x32xf32>
      %c0_78 = arith.constant 0 : index
      %c0_79 = arith.constant 0 : index
      %189 = vector.load %arg17[%c0_78, %c0_79] : memref<32x32xf32, #tpu.memory_space<vmem>>, vector<32x32xf32>
      tpu.vector_store %arg17[%c0_78, %c0_79], %188 {strides = array<i32>} : memref<32x32xf32, #tpu.memory_space<vmem>>, vector<32x32xf32>,
    } else {
    }
    %c0 = arith.constant 0 : index
    %c0_1 = arith.constant 0 : index
    %3 = vector.load %arg17[%c0, %c0_1] : memref<32x32xf32, #tpu.memory_space<vmem>>, vector<32x32xf32>
    %4 = arith.truncf %3 : vector<32x32xf32> to vector<32x32xbf16>
    %c0_2 = arith.constant 0 : index
    %c0_3 = arith.constant 0 : index
    %5 = vector.load %arg3[%c0_2, %c0_3] : memref<32x32xf32, #tpu.memory_space<vmem>>, vector<32x32xf32>
    %c0_4 = arith.constant 0 : index
    %c0_5 = arith.constant 0 : index
    %c0_6 = arith.constant 0 : index
    %6 = vector.load %arg4[%c0_4, %c0_5, %c0_6] : memref<1x32x96xbf16, #tpu.memory_space<vmem>>, vector<1x32x96xbf16>
    %7 = vector.shape_cast %6 : vector<1x32x96xbf16> to vector<32x96xbf16>
    %cst = arith.constant dense<0.000000e+00> : vector<32x96xf32>
    %8 = tpu.matmul %4, %7, %cst {dimension_numbers = #tpu.dot_dimension_numbers<[1], [0], [0], [1], [0, 0, 1, 1], [], []>} : vector<32x32xbf16>, vector<32x96xbf16>, vector<32x96xf32> -> vector<32x96xf32>
    %c0_7 = arith.constant 0 : index
    %c0_8 = arith.constant 0 : index
    %c0_9 = arith.constant 0 : index
    %9 = vector.load %arg5[%c0_7, %c0_8, %c0_9] : memref<1x32x32xbf16, #tpu.memory_space<vmem>>, vector<1x32x32xbf16>
    %10 = vector.shape_cast %9 : vector<1x32x32xbf16> to vector<32x32xbf16>
    %cst_10 = arith.constant 0.000000e+00 : f32
    %11 = vector.broadcast %cst_10 : f32 to vector<32x32xf32>
    %12 = vector.extract_strided_slice %8 {offsets = [0, 0], sizes = [32, 8], strides = [1, 1]} : vector<32x96xf32> to vector<32x8xf32>
    %13 = arith.truncf %12 : vector<32x8xf32> to vector<32x8xbf16>
    %14 = vector.extract_strided_slice %8 {offsets = [0, 32], sizes = [32, 8], strides = [1, 1]} : vector<32x96xf32> to vector<32x8xf32>
    %15 = arith.truncf %14 : vector<32x8xf32> to vector<32x8xbf16>
    %16 = vector.extract_strided_slice %8 {offsets = [0, 64], sizes = [32, 8], strides = [1, 1]} : vector<32x96xf32> to vector<32x8xf32>
    %17 = arith.truncf %16 : vector<32x8xf32> to vector<32x8xbf16>
    "tpu.trace_start"() <{level = 10 : i32, message = "qd,kd->qk"}> : () -> ()
    %cst_11 = arith.constant dense<0.000000e+00> : vector<32x32xf32>
    %18 = tpu.matmul %13, %15, %cst_11 {dimension_numbers = #tpu.dot_dimension_numbers<[1], [1], [0], [0], [0, 0, 1, 0], [], []>} : vector<32x8xbf16>, vector<32x8xbf16>, vector<32x32xf32> -> vector<32x32xf32>
    "tpu.trace_stop"() : () -> ()
    %19 = arith.addf %18, %5 : vector<32x32xf32>
    %cst_12 = arith.constant dense<0xFF800000> : vector<32xf32>
    %20 = vector.multi_reduction <maximumf>, %19, %cst_12 [1] : vector<32x32xf32> to vector<32xf32>
    %21 = vector.shape_cast %20 : vector<32xf32> to vector<32x1xf32>
    %22 = vector.broadcast %21 : vector<32x1xf32> to vector<32x32xf32>
    %23 = arith.subf %19, %22 : vector<32x32xf32>
    %24 = math.exp %23 : vector<32x32xf32>
    %25 = arith.truncf %24 : vector<32x32xf32> to vector<32x32xbf16>
    %cst_13 = arith.constant dense<0.000000e+00> : vector<32x8xf32>
    %26 = tpu.matmul %25, %17, %cst_13 {dimension_numbers = #tpu.dot_dimension_numbers<[1], [0], [0], [1], [0, 0, 1, 1], [], []>} : vector<32x32xbf16>, vector<32x8xbf16>, vector<32x8xf32> -> vector<32x8xf32>
    %cst_14 = arith.constant dense<0.000000e+00> : vector<32xf32>
    %27 = vector.multi_reduction <add>, %24, %cst_14 [1] : vector<32x32xf32> to vector<32xf32>
    %28 = vector.shape_cast %27 : vector<32xf32> to vector<32x1xf32>
    %29 = tpu.reciprocal %28 {approx = true} : vector<32x1xf32> -> vector<32x1xf32>
    %30 = vector.broadcast %29 : vector<32x1xf32> to vector<32x8xf32>
    %31 = arith.mulf %26, %30 : vector<32x8xf32>
    %32 = arith.truncf %31 : vector<32x8xf32> to vector<32x8xbf16>
    %33 = vector.extract_strided_slice %10 {offsets = [0, 0], sizes = [8, 32], strides = [1, 1]} : vector<32x32xbf16> to vector<8x32xbf16>
    %cst_15 = arith.constant dense<0.000000e+00> : vector<32x32xf32>
    %34 = tpu.matmul %32, %33, %cst_15 {dimension_numbers = #tpu.dot_dimension_numbers<[1], [0], [0], [1], [0, 0, 1, 1], [], []>} : vector<32x8xbf16>, vector<8x32xbf16>, vector<32x32xf32> -> vector<32x32xf32>
    %35 = arith.addf %11, %34 : vector<32x32xf32>
    %36 = vector.extract_strided_slice %8 {offsets = [0, 8], sizes = [32, 8], strides = [1, 1]} : vector<32x96xf32> to vector<32x8xf32>
    %37 = arith.truncf %36 : vector<32x8xf32> to vector<32x8xbf16>
    %38 = vector.extract_strided_slice %8 {offsets = [0, 40], sizes = [32, 8], strides = [1, 1]} : vector<32x96xf32> to vector<32x8xf32>
    %39 = arith.truncf %38 : vector<32x8xf32> to vector<32x8xbf16>
    %40 = vector.extract_strided_slice %8 {offsets = [0, 72], sizes = [32, 8], strides = [1, 1]} : vector<32x96xf32> to vector<32x8xf32>
    %41 = arith.truncf %40 : vector<32x8xf32> to vector<32x8xbf16>
    "tpu.trace_start"() <{level = 10 : i32, message = "qd,kd->qk"}> : () -> ()
    %cst_16 = arith.constant dense<0.000000e+00> : vector<32x32xf32>
    %42 = tpu.matmul %37, %39, %cst_16 {dimension_numbers = #tpu.dot_dimension_numbers<[1], [1], [0], [0], [0, 0, 1, 0], [], []>} : vector<32x8xbf16>, vector<32x8xbf16>, vector<32x32xf32> -> vector<32x32xf32>
    "tpu.trace_stop"() : () -> ()
    %43 = arith.addf %42, %5 : vector<32x32xf32>
    %cst_17 = arith.constant dense<0xFF800000> : vector<32xf32>
    %44 = vector.multi_reduction <maximumf>, %43, %cst_17 [1] : vector<32x32xf32> to vector<32xf32>
    %45 = vector.shape_cast %44 : vector<32xf32> to vector<32x1xf32>
    %46 = vector.broadcast %45 : vector<32x1xf32> to vector<32x32xf32>
    %47 = arith.subf %43, %46 : vector<32x32xf32>
    %48 = math.exp %47 : vector<32x32xf32>
    %49 = arith.truncf %48 : vector<32x32xf32> to vector<32x32xbf16>
    %cst_18 = arith.constant dense<0.000000e+00> : vector<32x8xf32>
    %50 = tpu.matmul %49, %41, %cst_18 {dimension_numbers = #tpu.dot_dimension_numbers<[1], [0], [0], [1], [0, 0, 1, 1], [], []>} : vector<32x32xbf16>, vector<32x8xbf16>, vector<32x8xf32> -> vector<32x8xf32>
    %cst_19 = arith.constant dense<0.000000e+00> : vector<32xf32>
    %51 = vector.multi_reduction <add>, %48, %cst_19 [1] : vector<32x32xf32> to vector<32xf32>
    %52 = vector.shape_cast %51 : vector<32xf32> to vector<32x1xf32>
    %53 = tpu.reciprocal %52 {approx = true} : vector<32x1xf32> -> vector<32x1xf32>
    %54 = vector.broadcast %53 : vector<32x1xf32> to vector<32x8xf32>
    %55 = arith.mulf %50, %54 : vector<32x8xf32>
    %56 = arith.truncf %55 : vector<32x8xf32> to vector<32x8xbf16>
    %57 = vector.extract_strided_slice %10 {offsets = [8, 0], sizes = [8, 32], strides = [1, 1]} : vector<32x32xbf16> to vector<8x32xbf16>
    %cst_20 = arith.constant dense<0.000000e+00> : vector<32x32xf32>
    %58 = tpu.matmul %56, %57, %cst_20 {dimension_numbers = #tpu.dot_dimension_numbers<[1], [0], [0], [1], [0, 0, 1, 1], [], []>} : vector<32x8xbf16>, vector<8x32xbf16>, vector<32x32xf32> -> vector<32x32xf32>
    %59 = arith.addf %35, %58 : vector<32x32xf32>
    %60 = vector.extract_strided_slice %8 {offsets = [0, 16], sizes = [32, 8], strides = [1, 1]} : vector<32x96xf32> to vector<32x8xf32>
    %61 = arith.truncf %60 : vector<32x8xf32> to vector<32x8xbf16>
    %62 = vector.extract_strided_slice %8 {offsets = [0, 48], sizes = [32, 8], strides = [1, 1]} : vector<32x96xf32> to vector<32x8xf32>
    %63 = arith.truncf %62 : vector<32x8xf32> to vector<32x8xbf16>
    %64 = vector.extract_strided_slice %8 {offsets = [0, 80], sizes = [32, 8], strides = [1, 1]} : vector<32x96xf32> to vector<32x8xf32>
    %65 = arith.truncf %64 : vector<32x8xf32> to vector<32x8xbf16>
    "tpu.trace_start"() <{level = 10 : i32, message = "qd,kd->qk"}> : () -> ()
    %cst_21 = arith.constant dense<0.000000e+00> : vector<32x32xf32>
    %66 = tpu.matmul %61, %63, %cst_21 {dimension_numbers = #tpu.dot_dimension_numbers<[1], [1], [0], [0], [0, 0, 1, 0], [], []>} : vector<32x8xbf16>, vector<32x8xbf16>, vector<32x32xf32> -> vector<32x32xf32>
    "tpu.trace_stop"() : () -> ()
    %67 = arith.addf %66, %5 : vector<32x32xf32>
    %cst_22 = arith.constant dense<0xFF800000> : vector<32xf32>
    %68 = vector.multi_reduction <maximumf>, %67, %cst_22 [1] : vector<32x32xf32> to vector<32xf32>
    %69 = vector.shape_cast %68 : vector<32xf32> to vector<32x1xf32>
    %70 = vector.broadcast %69 : vector<32x1xf32> to vector<32x32xf32>
    %71 = arith.subf %67, %70 : vector<32x32xf32>
    %72 = math.exp %71 : vector<32x32xf32>
    %73 = arith.truncf %72 : vector<32x32xf32> to vector<32x32xbf16>
    %cst_23 = arith.constant dense<0.000000e+00> : vector<32x8xf32>
    %74 = tpu.matmul %73, %65, %cst_23 {dimension_numbers = #tpu.dot_dimension_numbers<[1], [0], [0], [1], [0, 0, 1, 1], [], []>} : vector<32x32xbf16>, vector<32x8xbf16>, vector<32x8xf32> -> vector<32x8xf32>
    %cst_24 = arith.constant dense<0.000000e+00> : vector<32xf32>
    %75 = vector.multi_reduction <add>, %72, %cst_24 [1] : vector<32x32xf32> to vector<32xf32>
    %76 = vector.shape_cast %75 : vector<32xf32> to vector<32x1xf32>
    %77 = tpu.reciprocal %76 {approx = true} : vector<32x1xf32> -> vector<32x1xf32>
    %78 = vector.broadcast %77 : vector<32x1xf32> to vector<32x8xf32>
    %79 = arith.mulf %74, %78 : vector<32x8xf32>
    %80 = arith.truncf %79 : vector<32x8xf32> to vector<32x8xbf16>
    %81 = vector.extract_strided_slice %10 {offsets = [16, 0], sizes = [8, 32], strides = [1, 1]} : vector<32x32xbf16> to vector<8x32xbf16>
    %cst_25 = arith.constant dense<0.000000e+00> : vector<32x32xf32>
    %82 = tpu.matmul %80, %81, %cst_25 {dimension_numbers = #tpu.dot_dimension_numbers<[1], [0], [0], [1], [0, 0, 1, 1], [], []>} : vector<32x8xbf16>, vector<8x32xbf16>, vector<32x32xf32> -> vector<32x32xf32>
    %83 = arith.addf %59, %82 : vector<32x32xf32>
    %84 = vector.extract_strided_slice %8 {offsets = [0, 24], sizes = [32, 8], strides = [1, 1]} : vector<32x96xf32> to vector<32x8xf32>
    %85 = arith.truncf %84 : vector<32x8xf32> to vector<32x8xbf16>
    %86 = vector.extract_strided_slice %8 {offsets = [0, 56], sizes = [32, 8], strides = [1, 1]} : vector<32x96xf32> to vector<32x8xf32>
    %87 = arith.truncf %86 : vector<32x8xf32> to vector<32x8xbf16>
    %88 = vector.extract_strided_slice %8 {offsets = [0, 88], sizes = [32, 8], strides = [1, 1]} : vector<32x96xf32> to vector<32x8xf32>
    %89 = arith.truncf %88 : vector<32x8xf32> to vector<32x8xbf16>
    "tpu.trace_start"() <{level = 10 : i32, message = "qd,kd->qk"}> : () -> ()
    %cst_26 = arith.constant dense<0.000000e+00> : vector<32x32xf32>
    %90 = tpu.matmul %85, %87, %cst_26 {dimension_numbers = #tpu.dot_dimension_numbers<[1], [1], [0], [0], [0, 0, 1, 0], [], []>} : vector<32x8xbf16>, vector<32x8xbf16>, vector<32x32xf32> -> vector<32x32xf32>
    "tpu.trace_stop"() : () -> ()
    %91 = arith.addf %90, %5 : vector<32x32xf32>
    %cst_27 = arith.constant dense<0xFF800000> : vector<32xf32>
    %92 = vector.multi_reduction <maximumf>, %91, %cst_27 [1] : vector<32x32xf32> to vector<32xf32>
    %93 = vector.shape_cast %92 : vector<32xf32> to vector<32x1xf32>
    %94 = vector.broadcast %93 : vector<32x1xf32> to vector<32x32xf32>
    %95 = arith.subf %91, %94 : vector<32x32xf32>
    %96 = math.exp %95 : vector<32x32xf32>
    %97 = arith.truncf %96 : vector<32x32xf32> to vector<32x32xbf16>
    %cst_28 = arith.constant dense<0.000000e+00> : vector<32x8xf32>
    %98 = tpu.matmul %97, %89, %cst_28 {dimension_numbers = #tpu.dot_dimension_numbers<[1], [0], [0], [1], [0, 0, 1, 1], [], []>} : vector<32x32xbf16>, vector<32x8xbf16>, vector<32x8xf32> -> vector<32x8xf32>
    %cst_29 = arith.constant dense<0.000000e+00> : vector<32xf32>
    %99 = vector.multi_reduction <add>, %96, %cst_29 [1] : vector<32x32xf32> to vector<32xf32>
    %100 = vector.shape_cast %99 : vector<32xf32> to vector<32x1xf32>
    %101 = tpu.reciprocal %100 {approx = true} : vector<32x1xf32> -> vector<32x1xf32>
    %102 = vector.broadcast %101 : vector<32x1xf32> to vector<32x8xf32>
    %103 = arith.mulf %98, %102 : vector<32x8xf32>
    %104 = arith.truncf %103 : vector<32x8xf32> to vector<32x8xbf16>
    %105 = vector.extract_strided_slice %10 {offsets = [24, 0], sizes = [8, 32], strides = [1, 1]} : vector<32x32xbf16> to vector<8x32xbf16>
    %cst_30 = arith.constant dense<0.000000e+00> : vector<32x32xf32>
    %106 = tpu.matmul %104, %105, %cst_30 {dimension_numbers = #tpu.dot_dimension_numbers<[1], [0], [0], [1], [0, 0, 1, 1], [], []>} : vector<32x8xbf16>, vector<8x32xbf16>, vector<32x32xf32> -> vector<32x32xf32>
    %107 = arith.addf %83, %106 : vector<32x32xf32>
    %c0_31 = arith.constant 0 : index
    %c0_32 = arith.constant 0 : index
    %c0_33 = arith.constant 0 : index
    %108 = vector.load %arg6[%c0_31, %c0_32, %c0_33] : memref<1x1x32xf32, #tpu.memory_space<vmem>>, vector<1x1x32xf32>
    %109 = vector.shape_cast %108 : vector<1x1x32xf32> to vector<1x32xf32>
    %110 = vector.broadcast %109 : vector<1x32xf32> to vector<32x32xf32>
    %111 = arith.addf %107, %110 : vector<32x32xf32>
    %112 = arith.addf %3, %111 : vector<32x32xf32>
    %c0_34 = arith.constant 0 : index
    %c0_35 = arith.constant 0 : index
    %c0_36 = arith.constant 0 : index
    %113 = vector.load %arg7[%c0_34, %c0_35, %c0_36] : memref<1x1x32xf32, #tpu.memory_space<vmem>>, vector<1x1x32xf32>
    %114 = vector.shape_cast %113 : vector<1x1x32xf32> to vector<1x32xf32>
    %c0_37 = arith.constant 0 : index
    %c0_38 = arith.constant 0 : index
    %c0_39 = arith.constant 0 : index
    %115 = vector.load %arg8[%c0_37, %c0_38, %c0_39] : memref<1x1x32xf32, #tpu.memory_space<vmem>>, vector<1x1x32xf32>
    %116 = vector.shape_cast %115 : vector<1x1x32xf32> to vector<1x32xf32>
    %cst_40 = arith.constant dense<0.000000e+00> : vector<32xf32>
    %117 = vector.multi_reduction <add>, %112, %cst_40 [1] : vector<32x32xf32> to vector<32xf32>
    %118 = vector.shape_cast %117 : vector<32xf32> to vector<32x1xf32>
    %cst_41 = arith.constant 3.200000e+01 : f32
    %119 = vector.broadcast %cst_41 : f32 to vector<32x1xf32>
    %120 = arith.divf %118, %119 : vector<32x1xf32>
    %121 = vector.broadcast %120 : vector<32x1xf32> to vector<32x32xf32>
    %122 = arith.subf %112, %121 : vector<32x32xf32>
    %123 = arith.mulf %122, %122 : vector<32x32xf32>
    %cst_42 = arith.constant dense<0.000000e+00> : vector<32xf32>
    %124 = vector.multi_reduction <add>, %123, %cst_42 [1] : vector<32x32xf32> to vector<32xf32>
    %125 = vector.shape_cast %124 : vector<32xf32> to vector<32x1xf32>
    %cst_43 = arith.constant 3.200000e+01 : f32
    %126 = vector.broadcast %cst_43 : f32 to vector<32x1xf32>
    %127 = arith.divf %125, %126 : vector<32x1xf32>
    %cst_44 = arith.constant 9.99999974E-6 : f32
    %128 = vector.broadcast %cst_44 : f32 to vector<32x1xf32>
    %129 = arith.addf %127, %128 : vector<32x1xf32>
    %130 = math.rsqrt %129 : vector<32x1xf32>
    %131 = vector.broadcast %130 : vector<32x1xf32> to vector<32x32xf32>
    %132 = arith.mulf %122, %131 : vector<32x32xf32>
    %133 = vector.broadcast %114 : vector<1x32xf32> to vector<32x32xf32>
    %134 = arith.mulf %132, %133 : vector<32x32xf32>
    %135 = vector.broadcast %116 : vector<1x32xf32> to vector<32x32xf32>
    %136 = arith.addf %134, %135 : vector<32x32xf32>
    %137 = arith.truncf %136 : vector<32x32xf32> to vector<32x32xbf16>
    %c0_45 = arith.constant 0 : index
    %c0_46 = arith.constant 0 : index
    %c0_47 = arith.constant 0 : index
    %138 = vector.load %arg9[%c0_45, %c0_46, %c0_47] : memref<1x32x64xbf16, #tpu.memory_space<vmem>>, vector<1x32x64xbf16>
    %139 = vector.shape_cast %138 : vector<1x32x64xbf16> to vector<32x64xbf16>
    %cst_48 = arith.constant dense<0.000000e+00> : vector<32x64xf32>
    %140 = tpu.matmul %137, %139, %cst_48 {dimension_numbers = #tpu.dot_dimension_numbers<[1], [0], [0], [1], [0, 0, 1, 1], [], []>} : vector<32x32xbf16>, vector<32x64xbf16>, vector<32x64xf32> -> vector<32x64xf32>
    %c0_49 = arith.constant 0 : index
    %c0_50 = arith.constant 0 : index
    %c0_51 = arith.constant 0 : index
    %141 = vector.load %arg10[%c0_49, %c0_50, %c0_51] : memref<1x1x64xf32, #tpu.memory_space<vmem>>, vector<1x1x64xf32>
    %142 = vector.shape_cast %141 : vector<1x1x64xf32> to vector<1x64xf32>
    %143 = vector.broadcast %142 : vector<1x64xf32> to vector<32x64xf32>
    %144 = arith.addf %140, %143 : vector<32x64xf32>
    %cst_52 = arith.constant 0.000000e+00 : f32
    %145 = vector.broadcast %cst_52 : f32 to vector<32x64xf32>
    %146 = arith.maximumf %144, %145 : vector<32x64xf32>
    %147 = arith.truncf %146 : vector<32x64xf32> to vector<32x64xbf16>
    %c0_53 = arith.constant 0 : index
    %c0_54 = arith.constant 0 : index
    %c0_55 = arith.constant 0 : index
    %148 = vector.load %arg11[%c0_53, %c0_54, %c0_55] : memref<1x64x32xbf16, #tpu.memory_space<vmem>>, vector<1x64x32xbf16>
    %149 = vector.shape_cast %148 : vector<1x64x32xbf16> to vector<64x32xbf16>
    %cst_56 = arith.constant dense<0.000000e+00> : vector<32x32xf32>
    %150 = tpu.matmul %147, %149, %cst_56 {dimension_numbers = #tpu.dot_dimension_numbers<[1], [0], [0], [1], [0, 0, 1, 1], [], []>} : vector<32x64xbf16>, vector<64x32xbf16>, vector<32x32xf32> -> vector<32x32xf32>
    %c0_57 = arith.constant 0 : index
    %c0_58 = arith.constant 0 : index
    %c0_59 = arith.constant 0 : index
    %151 = vector.load %arg12[%c0_57, %c0_58, %c0_59] : memref<1x1x32xf32, #tpu.memory_space<vmem>>, vector<1x1x32xf32>
    %152 = vector.shape_cast %151 : vector<1x1x32xf32> to vector<1x32xf32>
    %153 = vector.broadcast %152 : vector<1x32xf32> to vector<32x32xf32>
    %154 = arith.addf %150, %153 : vector<32x32xf32>
    %155 = arith.addf %136, %154 : vector<32x32xf32>
    %c0_60 = arith.constant 0 : index
    %c0_61 = arith.constant 0 : index
    %c0_62 = arith.constant 0 : index
    %156 = vector.load %arg13[%c0_60, %c0_61, %c0_62] : memref<1x1x32xf32, #tpu.memory_space<vmem>>, vector<1x1x32xf32>
    %157 = vector.shape_cast %156 : vector<1x1x32xf32> to vector<1x32xf32>
    %c0_63 = arith.constant 0 : index
    %c0_64 = arith.constant 0 : index
    %c0_65 = arith.constant 0 : index
    %158 = vector.load %arg14[%c0_63, %c0_64, %c0_65] : memref<1x1x32xf32, #tpu.memory_space<vmem>>, vector<1x1x32xf32>
    %159 = vector.shape_cast %158 : vector<1x1x32xf32> to vector<1x32xf32>
    %cst_66 = arith.constant dense<0.000000e+00> : vector<32xf32>
    %160 = vector.multi_reduction <add>, %155, %cst_66 [1] : vector<32x32xf32> to vector<32xf32>
    %161 = vector.shape_cast %160 : vector<32xf32> to vector<32x1xf32>
    %cst_67 = arith.constant 3.200000e+01 : f32
    %162 = vector.broadcast %cst_67 : f32 to vector<32x1xf32>
    %163 = arith.divf %161, %162 : vector<32x1xf32>
    %164 = vector.broadcast %163 : vector<32x1xf32> to vector<32x32xf32>
    %165 = arith.subf %155, %164 : vector<32x32xf32>
    %166 = arith.mulf %165, %165 : vector<32x32xf32>
    %cst_68 = arith.constant dense<0.000000e+00> : vector<32xf32>
    %167 = vector.multi_reduction <add>, %166, %cst_68 [1] : vector<32x32xf32> to vector<32xf32>
    %168 = vector.shape_cast %167 : vector<32xf32> to vector<32x1xf32>
    %cst_69 = arith.constant 3.200000e+01 : f32
    %169 = vector.broadcast %cst_69 : f32 to vector<32x1xf32>
    %170 = arith.divf %168, %169 : vector<32x1xf32>
    %cst_70 = arith.constant 9.99999974E-6 : f32
    %171 = vector.broadcast %cst_70 : f32 to vector<32x1xf32>
    %172 = arith.addf %170, %171 : vector<32x1xf32>
    %173 = math.rsqrt %172 : vector<32x1xf32>
    %174 = vector.broadcast %173 : vector<32x1xf32> to vector<32x32xf32>
    %175 = arith.mulf %165, %174 : vector<32x32xf32>
    %176 = vector.broadcast %157 : vector<1x32xf32> to vector<32x32xf32>
    %177 = arith.mulf %175, %176 : vector<32x32xf32>
    %178 = vector.broadcast %159 : vector<1x32xf32> to vector<32x32xf32>
    %179 = arith.addf %177, %178 : vector<32x32xf32>
    %c1_i32 = arith.constant 1 : i32
    %180 = arith.cmpi slt, %arg0, %c1_i32 : i32
    %181 = arith.extui %180 : i1 to i32
    %c0_i32_71 = arith.constant 0 : i32
    %182 = arith.cmpi ne, %181, %c0_i32_71 : i32
    scf.if %182 {
      %c0_74 = arith.constant 0 : index
      %c0_75 = arith.constant 0 : index
      %186 = vector.load %arg17[%c0_74, %c0_75] : memref<32x32xf32, #tpu.memory_space<vmem>>, vector<32x32xf32>
      tpu.vector_store %arg17[%c0_74, %c0_75], %179 {strides = array<i32>} : memref<32x32xf32, #tpu.memory_space<vmem>>, vector<32x32xf32>,
    } else {
    }
    %c1_i32_72 = arith.constant 1 : i32
    %183 = arith.cmpi eq, %arg0, %c1_i32_72 : i32
    %184 = arith.extui %183 : i1 to i32
    %c0_i32_73 = arith.constant 0 : i32
    %185 = arith.cmpi ne, %184, %c0_i32_73 : i32
    scf.if %185 {
      %c0_74 = arith.constant 0 : index
      %c0_75 = arith.constant 0 : index
      %186 = vector.load %arg15[%c0_74, %c0_75] : memref<1x32xf32, #tpu.memory_space<vmem>>, vector<1x32xf32>
      %c0_76 = arith.constant 0 : index
      %c0_77 = arith.constant 0 : index
      %187 = vector.load %arg16[%c0_76, %c0_77] : memref<1x32xf32, #tpu.memory_space<vmem>>, vector<1x32xf32>
      %cst_78 = arith.constant dense<0.000000e+00> : vector<32xf32>
      %188 = vector.multi_reduction <add>, %179, %cst_78 [1] : vector<32x32xf32> to vector<32xf32>
      %189 = vector.shape_cast %188 : vector<32xf32> to vector<32x1xf32>
      %cst_79 = arith.constant 3.200000e+01 : f32
      %190 = vector.broadcast %cst_79 : f32 to vector<32x1xf32>
      %191 = arith.divf %189, %190 : vector<32x1xf32>
      %192 = vector.broadcast %191 : vector<32x1xf32> to vector<32x32xf32>
      %193 = arith.subf %179, %192 : vector<32x32xf32>
      %194 = arith.mulf %193, %193 : vector<32x32xf32>
      %cst_80 = arith.constant dense<0.000000e+00> : vector<32xf32>
      %195 = vector.multi_reduction <add>, %194, %cst_80 [1] : vector<32x32xf32> to vector<32xf32>
      %196 = vector.shape_cast %195 : vector<32xf32> to vector<32x1xf32>
      %cst_81 = arith.constant 3.200000e+01 : f32
      %197 = vector.broadcast %cst_81 : f32 to vector<32x1xf32>
      %198 = arith.divf %196, %197 : vector<32x1xf32>
      %cst_82 = arith.constant 9.99999974E-6 : f32
      %199 = vector.broadcast %cst_82 : f32 to vector<32x1xf32>
      %200 = arith.addf %198, %199 : vector<32x1xf32>
      %201 = math.rsqrt %200 : vector<32x1xf32>
      %202 = vector.broadcast %201 : vector<32x1xf32> to vector<32x32xf32>
      %203 = arith.mulf %193, %202 : vector<32x32xf32>
      %204 = vector.broadcast %186 : vector<1x32xf32> to vector<32x32xf32>
      %205 = arith.mulf %203, %204 : vector<32x32xf32>
      %206 = vector.broadcast %187 : vector<1x32xf32> to vector<32x32xf32>
      %207 = arith.addf %205, %206 : vector<32x32xf32>
      %c0_83 = arith.constant 0 : index
      %c0_84 = arith.constant 0 : index
      %208 = vector.load %arg17[%c0_83, %c0_84] : memref<32x32xf32, #tpu.memory_space<vmem>>, vector<32x32xf32>
      tpu.vector_store %arg17[%c0_83, %c0_84], %207 {strides = array<i32>} : memref<32x32xf32, #tpu.memory_space<vmem>>, vector<32x32xf32>,
    } else {
    }
    return
  }
  func.func @transform_0(%arg0: i32) -> (i32, i32) {
    %c0_i32 = arith.constant 0 : i32
    %c0_i32_0 = arith.constant 0 : i32
    %c0_i32_1 = arith.constant 0 : i32
    return %c0_i32, %c0_i32_0 : i32, i32
  }
  func.func @transform_1(%arg0: i32) -> (i32, i32) {
    %c0_i32 = arith.constant 0 : i32
    %c0_i32_0 = arith.constant 0 : i32
    %c0_i32_1 = arith.constant 0 : i32
    return %c0_i32, %c0_i32_0 : i32, i32
  }
  func.func @transform_2(%arg0: i32) -> (i32, i32) {
    %c0_i32 = arith.constant 0 : i32
    %c0_i32_0 = arith.constant 0 : i32
    %c0_i32_1 = arith.constant 0 : i32
    return %c0_i32, %c0_i32_0 : i32, i32
  }
  func.func @transform_3(%arg0: i32) -> (i32, i32, i32) {
    %c0_i32 = arith.constant 0 : i32
    %c0_i32_0 = arith.constant 0 : i32
    %c0_i32_1 = arith.constant 0 : i32
    return %arg0, %c0_i32, %c0_i32_0 : i32, i32, i32
  }
  func.func @transform_4(%arg0: i32) -> (i32, i32, i32) {
    %c0_i32 = arith.constant 0 : i32
    %c0_i32_0 = arith.constant 0 : i32
    %c0_i32_1 = arith.constant 0 : i32
    return %arg0, %c0_i32, %c0_i32_0 : i32, i32, i32
  }
  func.func @transform_5(%arg0: i32) -> (i32, i32, i32) {
    %c0_i32 = arith.constant 0 : i32
    %c0_i32_0 = arith.constant 0 : i32
    %c0_i32_1 = arith.constant 0 : i32
    return %arg0, %c0_i32, %c0_i32_0 : i32, i32, i32
  }
  func.func @transform_6(%arg0: i32) -> (i32, i32, i32) {
    %c0_i32 = arith.constant 0 : i32
    %c0_i32_0 = arith.constant 0 : i32
    %c0_i32_1 = arith.constant 0 : i32
    return %arg0, %c0_i32, %c0_i32_0 : i32, i32, i32
  }
  func.func @transform_7(%arg0: i32) -> (i32, i32, i32) {
    %c0_i32 = arith.constant 0 : i32
    %c0_i32_0 = arith.constant 0 : i32
    %c0_i32_1 = arith.constant 0 : i32
    return %arg0, %c0_i32, %c0_i32_0 : i32, i32, i32
  }
  func.func @transform_8(%arg0: i32) -> (i32, i32, i32) {
    %c0_i32 = arith.constant 0 : i32
    %c0_i32_0 = arith.constant 0 : i32
    %c0_i32_1 = arith.constant 0 : i32
    return %arg0, %c0_i32, %c0_i32_0 : i32, i32, i32
  }
  func.func @transform_9(%arg0: i32) -> (i32, i32, i32) {
    %c0_i32 = arith.constant 0 : i32
    %c0_i32_0 = arith.constant 0 : i32
    %c0_i32_1 = arith.constant 0 : i32
    return %arg0, %c0_i32, %c0_i32_0 : i32, i32, i32
  }
  func.func @transform_10(%arg0: i32) -> (i32, i32, i32) {
    %c0_i32 = arith.constant 0 : i32
    %c0_i32_0 = arith.constant 0 : i32
    %c0_i32_1 = arith.constant 0 : i32
    return %arg0, %c0_i32, %c0_i32_0 : i32, i32, i32
  }
  func.func @transform_11(%arg0: i32) -> (i32, i32, i32) {
    %c0_i32 = arith.constant 0 : i32
    %c0_i32_0 = arith.constant 0 : i32
    %c0_i32_1 = arith.constant 0 : i32
    return %arg0, %c0_i32, %c0_i32_0 : i32, i32, i32
  }
  func.func @transform_12(%arg0: i32) -> (i32, i32, i32) {
    %c0_i32 = arith.constant 0 : i32
    %c0_i32_0 = arith.constant 0 : i32
    %c0_i32_1 = arith.constant 0 : i32
    return %arg0, %c0_i32, %c0_i32_0 : i32, i32, i32
  }
  func.func @transform_13(%arg0: i32) -> (i32, i32, i32) {
    %c0_i32 = arith.constant 0 : i32
    %c0_i32_0 = arith.constant 0 : i32
    %c0_i32_1 = arith.constant 0 : i32
    return %arg0, %c0_i32, %c0_i32_0 : i32, i32, i32
  }
  func.func @transform_14(%arg0: i32) -> (i32, i32) {
    %c0_i32 = arith.constant 0 : i32
    %c0_i32_0 = arith.constant 0 : i32
    %c0_i32_1 = arith.constant 0 : i32
    return %c0_i32, %c0_i32_0 : i32, i32
  }
  func.func @transform_15(%arg0: i32) -> (i32, i32) {
    %c0_i32 = arith.constant 0 : i32
    %c0_i32_0 = arith.constant 0 : i32
    %c0_i32_1 = arith.constant 0 : i32
    return %c0_i32, %c0_i32_0 : i32, i32
  }
  func.func @transform_16(%arg0: i32) -> (i32, i32) {
    %c0_i32 = arith.constant 0 : i32
    %c0_i32_0 = arith.constant 0 : i32
    %c0_i32_1 = arith.constant 0 : i32
    return %c0_i32, %c0_i32_0 : i32, i32
  }
}

</mosaic_0001>

<bundles_post_ra>
// kernel: xformer_decoder_forward.3
= control target key start
LH: loop header
LB: loop body
LE: loop exit
PB: predicated region body
PF: predicated region fallthrough
CT: control target
= control target key end

     0   :  { %v186_v2 = vmov 0   ;;  %s249_s0 = inlined_call_operand.vmem [shape: f32[32,32], index: 0, kind: input, shape index: {}]   ;;  %s250_s1 = inlined_call_operand.vmem [shape: bf16[32,256], index: 1, kind: input, shape index: {}]   ;;  %s251_s2 = inlined_call_operand.vmem [shape: f32[1,256], index: 2, kind: input, shape index: {}]   ;;  %s252_s3 = inlined_call_operand.hbm [shape: f32[32,256], index: 3, kind: output, shape index: {}]  }
   0x1   :  { %v156_v0 = vld [vmem:[%s250_s1 + $0x4] ss:$8 sps:$4 sm:$0xff]   ;;  %v158_v1 = vld [vmem:[%s250_s1] ss:$8 sps:$4 sm:$0xff]   ;;  %97 = vmatprep.mubr.bf16.mxu0 %v186_v2  ;;  %107 = vmatprep.mubr.bf16.mxu1 %v186_v2  ;;  %v159_v3 = vld [vmem:[%s250_s1 + $0x14] ss:$8 sps:$4 sm:$0xff]  }
   0x2   :  { %65 = vmatprep.subr.bf16.mxu0 %v156_v0  ;;  %148 = vmatprep.subr.bf16.mxu1 %v156_v0  ;;  %v161_v4 = vld [vmem:[%s250_s1 + $0x10] ss:$8 sps:$4 sm:$0xff]   ;;  %v16_v5 = vld [vmem:[%s249_s0] sm:$0xff]  ;;  %v17_v6 = vld [vmem:[%s249_s0 + $0x8] sm:$0xff] }
   0x3   :  { %66 = vmatpush1.bf16.msra.mxu0 %v158_v1  ;;  %150 = vmatpush1.bf16.msra.mxu1 %v158_v1  ;;  %v18_v7 = vld [vmem:[%s249_s0 + $0x10] sm:$0xff]  ;;  %v19_v8 = vld [vmem:[%s249_s0 + $0x18] sm:$0xff] }
   0x4   :  { %67 = vmatprep.subr.bf16.mxu0 %v159_v3  ;;  %149 = vmatprep.subr.bf16.mxu1 %v159_v3 }
   0x5   :  { %8 = vsyncpa [#allocation3], 0  ;;  %v20_v9 = vpack.c.bf16 %v17_v6, %v16_v5  ;;  %v21_v10 = vpack.c.bf16 %v19_v8, %v18_v7  ;;  %vm58_vm0 = vcmask 261120   ;;  %v28_v11 = vlaneseq  ;;  %v26_v14 = vld [vmem:[%s251_s2] sm:$0x3]  ;;  %s187_s0 = smov [#allocation2]  }
   0x6   :  { %s131_s29 = sshll.u32 %s187_s0, 4  ;;  %s132_s29 = int_to_ptr.vmem [resolvable:$true] %s131_s29 }
   0x7   :  { %68 = vmatpush1.bf16.msra.mxu0 %v161_v4  ;;  %151 = vmatpush1.bf16.msra.mxu1 %v161_v4  ;;  %v29_v12 = vshrl.u32 %v28_v11, 7  ;;  %s162_s2 = scalar_lea.vmem %s132_s29, 1024  ;;  %p167_p1 = scmp.lt.s32.totalorder %s132_s29, %s132_s29 }
   0x8   :  { %p163_p0 = scmp.ne.s32.totalorder %s132_s29, %s162_s2  ;;  %p168_p2 = scmp.lt.s32.totalorder %s162_s2, %s162_s2 }
   0x9   :  { %v30_v13 = vsub.s32 0, %v29_v12  ;;  %v34_v15 = vsub.s32 1, %v29_v12 }
   0xa   :  { %146 = vmatmul.mubr.msk.bf16.vlgmr.msra.gmra.mrb[0].mxu0 %vm58_vm0, %v20_v9  ;;  %147 = vmatmul.mubr.msk.bf16.vlgmr.msra.gmra.mrb[0].mxu1 %vm58_vm0, %v21_v10  ;;  %p169_p3 = por %p168_p2, %p167_p1 }
   0xb   :  { %v31_v16 = vrot.slane %v26_v14, %v30_v13  ;;  %v35_v17 = vrot.slane %v26_v14, %v34_v15 }
   0xc   :  { %p170_p4 = pnand %p169_p3, %p163_p0 }
  0xdd   :  { %v99_v18 = vpop.f32.mrb[0].mxu0  ;;  %v109_v19 = vpop.f32.mrb[0].mxu1 }
  0xde   :  { %v100_v20 = vadd.f32 %v99_v18, %v31_v16  ;;  %v110_v21 = vadd.f32 %v109_v19, %v31_v16  ;;  %v101_v22 = vpop.f32.mrb[1].mxu0  ;;  %v111_v23 = vpop.f32.mrb[1].mxu1 }
  0xdf   :  { %v102_v24 = vadd.f32 %v101_v22, %v35_v17  ;;  %v112_v25 = vadd.f32 %v111_v23, %v35_v17  ;;  %v103_v26 = vpop.f32.mrb[2].mxu0  ;;  %v113_v27 = vpop.f32.mrb[2].mxu1 }
  0xe0   :  { %118 = vst [vmem:[#allocation2] sm:$0xff] %v100_v20  ;;  %122 = vst [vmem:[#allocation2 + $0x20] sm:$0xff] %v110_v21  ;;  %v104_v28 = vadd.f32 %v103_v26, %v31_v16  ;;  %v114_v29 = vadd.f32 %v113_v27, %v31_v16  ;;  %v105_v30 = vpop.f32.mrb[3].mxu0  ;;  %v115_v31 = vpop.f32.mrb[3].mxu1 }
  0xe1   :  { %119 = vst [vmem:[#allocation2 + $0x8] sm:$0xff] %v102_v24  ;;  %123 = vst [vmem:[#allocation2 + $0x28] sm:$0xff] %v112_v25  ;;  %v106_v32 = vadd.f32 %v105_v30, %v35_v17  ;;  %v116_v33 = vadd.f32 %v115_v31, %v35_v17 }
  0xe2   :  { %120 = vst [vmem:[#allocation2 + $0x10] sm:$0xff] %v104_v28  ;;  %124 = vst [vmem:[#allocation2 + $0x30] sm:$0xff] %v114_v29 }
  0xe3   :  { %121 = vst [vmem:[#allocation2 + $0x18] sm:$0xff] %v106_v32  ;;  %125 = vst [vmem:[#allocation2 + $0x38] sm:$0xff] %v116_v33 }
  0xe4   :  { %173 = shalt.err (!%p170_p4)
}
  0xe5   :  { %s174_s5 = scalar_lea.hbm %s252_s3, 1024 }
  0xe6   :  { %p175_p5 = scmp.ne.s32.totalorder %s252_s3, %s174_s5  ;;  %p178_p6 = scmp.lt.u32.totalorder %s174_s5, %s252_s3 }
  0xe8   :  { %p180_p7 = pnand %p178_p6, %p175_p5 }
  0xea   :  { %183 = shalt.err (!%p180_p7)
}
  0xeb   :  { %s188_s10 = smov 256   ;;  %s189_s11 = smov 16  }
  0xec   :  { %137 = dma.vmem_to_hbm [thread:$0]  %s132_s29, 1024, %s252_s3, [#allocation3], %s188_s10, %s188_s10, %s189_s11  }
  0xed   :  { %184 = dma.done.wait [#allocation3], 1024  }
  0xee   :  { %185 = vsyncadd [#allocation3], 4294966272 }
  0xef   :  { %141 = vsyncpa [#allocation3], 1 }

// kernel: xformer_decoder_forward.2
= control target key start
LH: loop header
LB: loop body
LE: loop exit
PB: predicated region body
PF: predicated region fallthrough
CT: control target
= control target key end

     0   :  { %s2778_s21 = smov 0   ;;  %s3216_s0 = inlined_call_operand.vmem [shape: f32[32,32], index: 0, kind: input, shape index: {}]   ;;  %s3217_s1 = inlined_call_operand.vmem [shape: f32[32,32], index: 1, kind: input, shape index: {}]   ;;  %s3218_s2 = inlined_call_operand.vmem [shape: f32[32,32], index: 2, kind: input, shape index: {}]   ;;  %s3219_s3 = inlined_call_operand.vmem [shape: bf16[2,32,96], index: 3, kind: input, shape index: {}]   ;;  %s3220_s4 = inlined_call_operand.vmem [shape: bf16[2,32,32], index: 4, kind: input, shape index: {}]   ;;  %s3221_s5 = inlined_call_operand.vmem [shape: f32[2,1,32], index: 5, kind: input, shape index: {}]   ;;  %s3222_s6 = inlined_call_operand.vmem [shape: f32[2,1,32], index: 6, kind: input, shape index: {}]   ;;  %s3223_s7 = inlined_call_operand.vmem [shape: f32[2,1,32], index: 7, kind: input, shape index: {}]   ;;  %s3224_s8 = inlined_call_operand.vmem [shape: bf16[2,32,64], index: 8, kind: input, shape index: {}]   ;;  %s3225_s9 = inlined_call_operand.vmem [shape: f32[2,1,64], index: 9, kind: input, shape index: {}]   ;;  %s3226_s10 = inlined_call_operand.vmem [shape: bf16[2,64,32], index: 10, kind: input, shape index: {}]   ;;  %s3227_s11 = inlined_call_operand.vmem [shape: f32[2,1,32], index: 11, kind: input, shape index: {}]   ;;  %s3228_s12 = inlined_call_operand.vmem [shape: f32[2,1,32], index: 12, kind: input, shape index: {}]   ;;  %s3229_s13 = inlined_call_operand.vmem [shape: f32[2,1,32], index: 13, kind: input, shape index: {}]   ;;  %s3230_s14 = inlined_call_operand.vmem [shape: f32[1,32], index: 14, kind: input, shape index: {}]   ;;  %s3231_s15 = inlined_call_operand.vmem [shape: f32[1,32], index: 15, kind: input, shape index: {}]   ;;  %s3232_s16 = inlined_call_operand.vmem [shape: f32[32,32], index: 16, kind: output, shape index: {}]  }
   0x1   :  { %3236 = sst [smem:[#allocation3_spill]] %s3216_s0 }
   0x2   :  { %3237 = sst [smem:[#allocation4_spill]] %s3218_s2 }
   0x3   :  { %3238 = sst [smem:[#allocation5_spill]] %s3219_s3 }
   0x4   :  { %3239 = sst [smem:[#allocation6_spill]] %s3220_s4 }
   0x5   :  { %3240 = sst [smem:[#allocation7_spill]] %s3221_s5 }
   0x6   :  { %3241 = sst [smem:[#allocation8_spill]] %s3230_s14 }
   0x7   :  { %3242 = sst [smem:[#allocation9_spill]] %s3231_s15 }
   0x8 LB: > { %3243 = sst [smem:[#allocation2_spill]] %s2680_s21  ;;  %s2784_s22 = sadd.s32 4294967295, %s2680_s21   ;;  %s2680_s21 = sphi %s2778_s21, %s26_s21  }
   0x9   : > { %p2296_p0 = scmp.ge.s32.totalorder %s2680_s21, 1  ;;  %p543_p1 = scmp.lt.s32.totalorder %s2680_s21, 3 }
   0xb   : > { %p544_p2 = pnand %p2296_p0, %p543_p1 }
   0xc   : > { %p624_p3 = scmp.lt.s32.totalorder (!%p544_p2), %s2784_s22, 1  ;;  %s3245_s3 = sld [smem:[#allocation5_spill]] (!%p544_p2) }
   0xd   : > { %547 = sbr.rel (%p544_p2) target bundleno = 3484 (0xd9c), region = 84  ;;  %s3246_s4 = sld [smem:[#allocation6_spill]] (!%p544_p2) }
   0xe   : > { %p2305_p4 = scmp.ne.s32.totalorder (!%p544_p2), %s2784_s22, 0 }
  0x14   : > { %s2790_s23 = scalar_select %p624_p3, %s2784_s22, 1 }
  0x15   : > { %669 = sbr.rel (%p2305_p4) target bundleno = 37 (0x25), region = 88  ;;  %v674_v1 = vld [vmem:[%s3217_s1] sm:$0xff] (!%p2305_p4)  ;;  %vm682_vm0 = vcmask (!%p2305_p4), 261120   ;;  %v675_v4 = vld [vmem:[%s3217_s1 + $0x8] sm:$0xff] (!%p2305_p4)  ;;  %v676_v6 = vld [vmem:[%s3217_s1 + $0x10] sm:$0xff] (!%p2305_p4) }
  0x16   : > { %s2357_s24 = sshll.u32 %s2790_s23, 4  ;;  %s2360_s0 = sshll.u32 %s2790_s23, 5  ;;  %v677_v10 = vld [vmem:[%s3217_s1 + $0x18] sm:$0xff] (!%p2305_p4) }
  0x17   : > { %s2800_s30 = scalar_lea.vmem %s3245_s3, %s2357_s24  ;;  %s2805_s18 = scalar_lea.vmem %s3246_s4, %s2357_s24 }
  0x18   : > { %s2818_s27 = scalar_lea.vmem %s3224_s8, %s2357_s24  ;;  %s650_s3 = scalar_lea.vmem %s3225_s9, %s2790_s23 }
  0x19   : > { %s2832_s21 = scalar_lea.vmem %s3226_s10, %s2360_s0  ;;  %s661_s25 = scalar_lea.vmem %s3228_s12, %s2790_s23 }
  0x1a   : > { %s664_s2 = scalar_lea.vmem %s3229_s13, %s2790_s23  ;;  %s3247_s4 = sld [smem:[#allocation3_spill]] (!%p2305_p4) }
  0x20   : > { %v670_v0 = vld [vmem:[%s3247_s4] sm:$0xff]  ;;  %v671_v2 = vld [vmem:[%s3247_s4 + $0x8] sm:$0xff]  ;;  %v672_v5 = vld [vmem:[%s3247_s4 + $0x10] sm:$0xff] }
  0x21   : > { %v678_v3 = vadd.f32 %v674_v1, %v670_v0  ;;  %v679_v7 = vadd.f32 %v675_v4, %v671_v2  ;;  %v680_v8 = vadd.f32 %v676_v6, %v672_v5  ;;  %v673_v9 = vld [vmem:[%s3247_s4 + $0x18] sm:$0xff] }
  0x22   : > { %v681_v11 = vadd.f32 %v677_v10, %v673_v9 }
  0x23   : > { %683 = vst.msk [vmem:[%s3232_s16] sm:$0xff] %vm682_vm0, %v678_v3  ;;  %684 = vst.msk [vmem:[%s3232_s16 + $0x8] sm:$0xff] %vm682_vm0, %v679_v7 }
  0x24   : > { %685 = vst.msk [vmem:[%s3232_s16 + $0x10] sm:$0xff] %vm682_vm0, %v680_v8  ;;  %686 = vst.msk [vmem:[%s3232_s16 + $0x18] sm:$0xff] %vm682_vm0, %v681_v11 }
  0x25 PF: > { %v2578_v12 = vld [vmem:[%s2800_s30] sm:$0xff]   ;;  %v2579_v13 = vld [vmem:[%s2800_s30 + $0x8] sm:$0xff]   ;;  %vm713_vm1 = vcmask 261120   ;;  %vm781_vm2 = vcmask 64512   ;;  %s2682_s24 = smov 64   ;;  %s2683_s26 = smov 96  }
  0x26   : > { %2419 = vmatprep.subr.bf16.mxu1 %v2578_v12  ;;  %s3248_s29 = sld [smem:[#allocation4_spill]]  ;;  %s2684_s15 = smov 120   ;;  %vm1136_vm3 = vcmask 1043456   ;;  %vm1942_vm4 = vcmask 523264  }
  0x27   : > { %2420 = vmatpush3.bf16.msra.mxu1 %v2578_v12  ;;  %s2687_s28 = smov 112   ;;  %s2688_s5 = smov 56  }
  0x28   : > { %2421 = vmatprep.subr.bf16.mxu1 %v2579_v13  ;;  %s2689_s17 = smov 72   ;;  %s2690_s0 = smov 104  }
  0x29   : > { %s2691_s19 = smov 48   ;;  %s2692_s20 = smov 40  }
  0x2a   : > { %v2884_v14 = vld [vmem:[%s3232_s16] sm:$0xff]  ;;  %v2889_v15 = vld [vmem:[%s3232_s16 + $0x8] sm:$0xff]  ;;  %s3249_s30 = sld [smem:[#allocation7_spill]]  ;;  %p2351_p5 = scmp.ge.s32.totalorder %s2784_s22, 1 }
  0x2b   : > { %v2894_v16 = vld [vmem:[%s3232_s16 + $0x10] sm:$0xff]  ;;  %v691_v17 = vpack.c.bf16 %v2889_v15, %v2884_v14  ;;  %v2901_v18 = vld [vmem:[%s3232_s16 + $0x18] sm:$0xff]  ;;  %2422 = vmatpush3.bf16.msra.mxu1 %v2579_v13 }
  0x2c   : > { %v692_v19 = vpack.c.bf16 %v2901_v18, %v2894_v16  ;;  %v2926_v32 = vld [vmem:[%s3248_s29 + $0x10] sm:$0xff]  ;;  %v2931_v33 = vld [vmem:[%s3248_s29] sm:$0xff]  ;;  %v2937_v37 = vld [vmem:[%s3248_s29 + $0x18] sm:$0xff] }
  0x2d   : > { %2423 = vmatprep.mubr.msk.bf16.mxu1 %vm713_vm1, %v691_v17  ;;  %v2946_v44 = vld [vmem:[%s3248_s29 + $0x8] sm:$0xff] }
  0x2e   : > { %2424 = vmatmul.mubr.msk.bf16.vlgmr.msra.gmra.mrb[0].mxu1 %vm713_vm1, %v692_v19 }
 0x101   : > { %v2425_v20 = vpop.f32.mrb[0].mxu1 }
 0x102   : > { %v754_v21 = vpop.f32.mrb[1].mxu1 }
 0x103   : > { %v2426_v22 = vpop.f32.mrb[2].mxu1 }
 0x104   : > { %v2907_v23 = vpack.c.bf16 %v2426_v22, %v2425_v20  ;;  %v757_v24 = vpop.f32.mrb[3].mxu1 }
 0x105   : > { %v2909_v25 = vpack.c.bf16 %v757_v24, %v754_v21 }
 0x107   : > { %869 = vrot.lane.b32.xlu1 %v2909_v25, %s2682_s24  ;;  %777 = vrot.lane.b32.xlu0 %v2909_v25, %s2683_s26 }
 0x108   : > { %2431 = vmatprep.mubr.msk.bf16.mxu1 %vm781_vm2, %v2909_v25 }
 0x10b   : > { %871 = vrot.lane.b32.xlu1 %v2907_v23, %s2682_s24  ;;  %779 = vrot.lane.b32.xlu0 %v2907_v23, %s2683_s26  ;;  %s2685_s24 = smov 88   ;;  %s2686_s26 = smov 80  }
 0x179   : > { %v870_v26 = vpop.permute.xlu1 %869  ;;  %v778_v27 = vpop.permute.xlu0 %777 }
 0x17a   : > { %v789_v28 = vsel %vm781_vm2, %v778_v27, 0  ;;  %2547 = vmatprep.subr.msk.bf16.mxu1 %vm781_vm2, %v778_v27  ;;  %2435 = vmatprep.subr.bf16.mxu0 %v870_v26 }
 0x17b   : > { %2428 = vmatpush3.bf16.xpose.msra.mxu1 %v789_v28  ;;  %2436 = vmatpush3.bf16.msra.mxu0 %v870_v26 }
 0x17d   : > { %v872_v29 = vpop.permute.xlu1 %871  ;;  %v780_v30 = vpop.permute.xlu0 %779 }
 0x17e   : > { %2548 = vmatprep.subr.msk.bf16.mxu1 %vm781_vm2, %v780_v30  ;;  %2437 = vmatprep.subr.bf16.mxu0 %v872_v29  ;;  %v792_v31 = vsel %vm781_vm2, %v780_v30, 0 }
 0x17f   : > { %2438 = vmatpush3.bf16.msra.mxu0 %v872_v29 }
 0x183   : > { %2430 = vmatpush3.bf16.xpose.msra.mxu1 %v792_v31 }
 0x18a   : > { %2432 = vmatmul.mubr.msk.bf16.vlgmr.msra.gmra.mrb[4].mxu1 %vm781_vm2, %v2907_v23 }
 0x25d   : > { %v2433_v34 = vpop.f32.mrb[4].mxu1 }
 0x25e   : > { %v837_v35 = vadd.f32 %v2433_v34, %v2926_v32  ;;  %v828_v36 = vpop.f32.mrb[5].mxu1 }
 0x25f   : > { %v829_v38 = vadd.f32 %v828_v36, %v2931_v33  ;;  %v2434_v39 = vpop.f32.mrb[6].mxu1 }
 0x260   : > { %v831_v40 = vpop.f32.mrb[7].mxu1  ;;  %v849_v41 = vsel %vm713_vm1, %v837_v35, -inf  ;;  %v840_v42 = vadd.f32 %v2434_v39, %v2937_v37 }
 0x261   : > { %850 = vmax.xlane.f32.xlu0 %v849_v41  ;;  %v843_v43 = vsel %vm713_vm1, %v829_v38, -inf  ;;  %v832_v45 = vadd.f32 %v831_v40, %v2946_v44 }
 0x262   : > { %844 = vmax.xlane.f32.xlu1 %v843_v43  ;;  %v852_v46 = vsel %vm713_vm1, %v840_v42, -inf }
 0x263   : > { %v846_v47 = vsel %vm713_vm1, %v832_v45, -inf }
 0x266   : > { %853 = vmax.xlane.f32.xlu1 %v852_v46 }
 0x26a   : > { %847 = vmax.xlane.f32.xlu1 %v846_v47 }
 0x277   : > { %952 = vrot.lane.b32.xlu0 %v2909_v25, %s2684_s15 }
 0x27b   : > { %956 = vrot.lane.b32.xlu1 %v2909_v25, %s2685_s24 }
 0x27f   : > { %958 = vrot.lane.b32.xlu1 %v2907_v23, %s2685_s24 }
 0x283   : > { %954 = vrot.lane.b32.xlu1 %v2907_v23, %s2684_s15  ;;  %s3250_s15 = scalar_lea.vmem %s3249_s30, %s2790_s23 }
 0x287   : > { %1251 = vrot.lane.b32.xlu1 %v2909_v25, %s2686_s26 }
 0x28b   : > { %1253 = vrot.lane.b32.xlu1 %v2907_v23, %s2686_s26  ;;  %s3251_s26 = scalar_lea.vmem %s3222_s6, %s2790_s23 }
 0x28f   : > { %1247 = vrot.lane.b32.xlu1 %v2909_v25, %s2687_s28 }
 0x293   : > { %1249 = vrot.lane.b32.xlu1 %v2907_v23, %s2687_s28 }
 0x2ee   : > { %v851_v49 = vpop.xlane.xlu0 %850 }
 0x2ef   : > { %v845_v48 = vpop.xlane.xlu1 %844  ;;  %v857_v53 = vsub.f32 %v837_v35, %v851_v49 }
 0x2f0   : > { %v855_v50 = vsub.f32 %v829_v38, %v845_v48 }
 0x2f1   : > { %v863_v58 = vmul.f32 1.442695, %v857_v53 }
 0x2f2   : > { %v859_v54 = vmul.f32 1.442695, %v855_v50  ;;  %v953_v5 = vpop.permute.xlu0 %952 }
 0x2f3   : > { %v854_v51 = vpop.xlane.xlu1 %853 }
 0x2f4   : > { %v858_v52 = vsub.f32 %v840_v42, %v854_v51  ;;  %2586 = vpow2.f32 %v859_v54 }
 0x2f6   : > { %v865_v55 = vmul.f32 1.442695, %v858_v52 }
 0x2f7   : > { %v848_v56 = vpop.xlane.xlu1 %847 }
 0x2f8   : > { %v856_v57 = vsub.f32 %v832_v45, %v848_v56  ;;  %2588 = vpow2.f32 %v865_v55 }
 0x2fa   : > { %v861_v59 = vmul.f32 1.442695, %v856_v57 }
 0x2fb   : > { %v957_v60 = vpop.permute.xlu1 %956 }
 0x2fc   : > { %2590 = vpow2.f32 %v861_v59  ;;  %2549 = vmatprep.subr.msk.bf16.mxu0 %vm781_vm2, %v957_v60  ;;  %v967_v6 = vsel %vm781_vm2, %v957_v60, 0 }
 0x2fd   : > { %2592 = vpow2.f32 %v863_v58 }
 0x2fe   : > { %v2587_v62 = vpop.eup %2586 }
 0x2ff   : > { %v959_v61 = vpop.permute.xlu1 %958  ;;  %v930_v43 = vsel %vm713_vm1, %v2587_v62, 0.0 }
 0x300   : > { %v970_v8 = vsel %vm781_vm2, %v959_v61, 0 }
 0x302   : > { %v2960_v63 = vpop.eup %2588 }
 0x303   : > { %v955_v3 = vpop.permute.xlu1 %954 }
 0x306   : > { %v2962_v0 = vpop.eup %2590 }
 0x307   : > { %v2593_v1 = vpop.eup %2592  ;;  %v867_v2 = vpack.c.bf16 %v2962_v0, %v2587_v62  ;;  %v1252_v7 = vpop.permute.xlu1 %1251 }
 0x308   : > { %v868_v4 = vpack.c.bf16 %v2960_v63, %v2593_v1  ;;  %v1262_v10 = vsel %vm781_vm2, %v1252_v7, 0  ;;  %v936_v45 = vsel %vm713_vm1, %v2593_v1, 0.0 }
 0x309   : > { %2439 = vmatprep.mubr.msk.bf16.mxu0 %vm713_vm1, %v867_v2 }
 0x30a   : > { %2440 = vmatmul.mubr.msk.bf16.vlgmr.msra.gmra.mrb[0].mxu0 %vm713_vm1, %v868_v4 }
 0x30b   : > { %2444 = vmatpush3.bf16.xpose.msra.mxu0 %v967_v6  ;;  %2447 = vmatprep.mubr.msk.bf16.mxu0 %vm781_vm2, %v953_v5  ;;  %v1254_v9 = vpop.permute.xlu1 %1253 }
 0x30c   : > { %2550 = vmatprep.subr.msk.bf16.mxu0 %vm781_vm2, %v959_v61  ;;  %v1265_v12 = vsel %vm781_vm2, %v1254_v9, 0 }
 0x30f   : > { %v1248_v11 = vpop.permute.xlu1 %1247 }
 0x313   : > { %2446 = vmatpush3.bf16.xpose.msra.mxu0 %v970_v8  ;;  %v1250_v13 = vpop.permute.xlu1 %1249 }
 0x314   : > { %2553 = vmatprep.subr.msk.bf16.mxu0 %vm781_vm2, %v1252_v7 }
 0x31a   : > { %2448 = vmatmul.mubr.msk.bf16.vlgmr.msra.gmra.mrb[4].mxu0 %vm781_vm2, %v955_v3 }
 0x31b   : > { %2472 = vmatpush3.bf16.xpose.msra.mxu0 %v1262_v10  ;;  %2475 = vmatprep.mubr.msk.bf16.mxu0 %vm781_vm2, %v1248_v11 }
 0x31c   : > { %2554 = vmatprep.subr.msk.bf16.mxu0 %vm781_vm2, %v1254_v9 }
 0x323   : > { %2474 = vmatpush3.bf16.xpose.msra.mxu0 %v1265_v12 }
 0x32a   : > { %2476 = vmatmul.mubr.msk.bf16.vlgmr.msra.gmra.mrb[8].mxu0 %vm781_vm2, %v1250_v13 }
 0x3dd   : > { %v2979_v17 = vpop.f32.mrb[0].mxu0 }
 0x3de   : > { %v2981_v19 = vpop.f32.mrb[1].mxu0 }
 0x3df   : > { %v2983_v20 = vpop.f32.mrb[2].mxu0 }
 0x3e0   : > { %v2985_v21 = vpop.f32.mrb[3].mxu0 }
 0x3ed   : > { %v2449_v22 = vpop.f32.mrb[4].mxu0 }
 0x3ee   : > { %v1015_v24 = vadd.f32 %v2449_v22, %v2926_v32  ;;  %v1006_v26 = vpop.f32.mrb[5].mxu0 }
 0x3ef   : > { %v2450_v27 = vpop.f32.mrb[6].mxu0  ;;  %v1007_v28 = vadd.f32 %v1006_v26, %v2931_v33 }
 0x3f0   : > { %v1009_v29 = vpop.f32.mrb[7].mxu0  ;;  %v1027_v30 = vsel %vm713_vm1, %v1015_v24, -inf  ;;  %v1018_v35 = vadd.f32 %v2450_v27, %v2937_v37 }
 0x3f1   : > { %v1010_v31 = vadd.f32 %v1009_v29, %v2946_v44  ;;  %1028 = vmax.xlane.f32.xlu0 %v1027_v30  ;;  %v1021_v36 = vsel %vm713_vm1, %v1007_v28, -inf  ;;  %v939_v30 = vsel %vm713_vm1, %v2960_v63, 0.0 }
 0x3f2   : > { %v1030_v38 = vsel %vm713_vm1, %v1018_v35, -inf }
 0x3f3   : > { %v1024_v34 = vsel %vm713_vm1, %v1010_v31, -inf }
 0x3f4   : > { %1025 = vmax.xlane.f32.xlu1 %v1024_v34 }
 0x3f5   : > { %1022 = vmax.xlane.f32.xlu0 %v1021_v36  ;;  %v3045_v36 = vld [vmem:[%s2805_s18] sm:$0xf] }
 0x3f9   : > { %1031 = vmax.xlane.f32.xlu0 %v1030_v38 }
 0x3fd   : > { %v2477_v39 = vpop.f32.mrb[8].mxu0 }
 0x3fe   : > { %v1301_v40 = vpop.f32.mrb[9].mxu0  ;;  %v3020_v12 = vadd.f32 %v2477_v39, %v2926_v32 }
 0x3ff   : > { %v2995_v41 = vpop.f32.mrb[10].mxu0  ;;  %v3013_v6 = vadd.f32 %v1301_v40, %v2931_v33 }
 0x400   : > { %v2997_v42 = vpop.f32.mrb[11].mxu0  ;;  %v1322_v27 = vsel %vm713_vm1, %v3020_v12, -inf }
 0x401   : > { %v1316_v13 = vsel %vm713_vm1, %v3013_v6, -inf  ;;  %v1305_v29 = vadd.f32 %v2997_v42, %v2946_v44 }
 0x403   : > { %v1319_v34 = vsel %vm713_vm1, %v1305_v29, -inf }
 0x405   : > { %1047 = vrot.lane.b32.xlu1 %v2909_v25, %s2688_s5 }
 0x409   : > { %1491 = vrot.lane.b32.xlu1 %v2909_v25, %s2689_s17 }
 0x40d   : > { %1493 = vrot.lane.b32.xlu1 %v2907_v23, %s2689_s17  ;;  %s3252_s17 = scalar_lea.vmem %s3223_s7, %s2790_s23 }
 0x40f   : > { %1049 = vrot.lane.b32.xlu0 %v2907_v23, %s2688_s5 }
 0x411   : > { %1489 = vrot.lane.b32.xlu1 %v2907_v23, %s2690_s0 }
 0x413   : > { %1487 = vrot.lane.b32.xlu0 %v2909_v25, %s2690_s0 }
 0x435   : > { %931 = vadd.xlane.f32.xlu1 %v930_v43 }
 0x439   : > { %937 = vadd.xlane.f32.xlu1 %v936_v45 }
 0x47e   : > { %v1029_v46 = vpop.xlane.xlu0 %1028 }
 0x47f   : > { %v1035_v47 = vsub.f32 %v1015_v24, %v1029_v46 }
 0x481   : > { %v1041_v48 = vmul.f32 1.442695, %v1035_v47  ;;  %v1026_v49 = vpop.xlane.xlu1 %1025 }
 0x482   : > { %v1034_v50 = vsub.f32 %v1010_v31, %v1026_v49  ;;  %v1023_v51 = vpop.xlane.xlu0 %1022  ;;  %v1313_v31 = vadd.f32 %v2995_v41, %v2937_v37 }
 0x483   : > { %2594 = vpow2.f32 %v1041_v48  ;;  %v1033_v52 = vsub.f32 %v1007_v28, %v1023_v51  ;;  %v933_v28 = vsel %vm713_vm1, %v2962_v0, 0.0  ;;  %v770_v0 = vld [vmem:[%s2805_s18 + $0x4] sm:$0xf] }
 0x484   : > { %v1039_v53 = vmul.f32 1.442695, %v1034_v50  ;;  %v1138_v63 = vsel %vm1136_vm3, %v770_v0, 0 }
 0x485   : > { %v1037_v54 = vmul.f32 1.442695, %v1033_v52  ;;  %v1048_v55 = vpop.permute.xlu1 %1047 }
 0x486   : > { %2596 = vpow2.f32 %v1039_v53  ;;  %v1032_v56 = vpop.xlane.xlu0 %1031  ;;  %2451 = vmatprep.subr.bf16.mxu1 %v1048_v55 }
 0x487   : > { %2598 = vpow2.f32 %v1037_v54  ;;  %v1036_v57 = vsub.f32 %v1018_v35, %v1032_v56  ;;  %2452 = vmatpush3.bf16.msra.mxu1 %v1048_v55  ;;  %v1325_v35 = vsel %vm713_vm1, %v1313_v31, -inf }
 0x489   : > { %v1043_v58 = vmul.f32 1.442695, %v1036_v57  ;;  %v1492_v59 = vpop.permute.xlu1 %1491 }
 0x48a   : > { %v1502_v60 = vsel %vm781_vm2, %v1492_v59, 0  ;;  %v1050_v61 = vpop.permute.xlu0 %1049  ;;  %2556 = vmatprep.subr.msk.bf16.mxu0 %vm781_vm2, %v1492_v59 }
 0x48b   : > { %2600 = vpow2.f32 %v1043_v58  ;;  %2453 = vmatprep.subr.bf16.mxu1 %v1050_v61  ;;  %2494 = vmatpush3.bf16.xpose.msra.mxu0 %v1502_v60 }
 0x48c   : > { %2454 = vmatpush3.bf16.msra.mxu1 %v1050_v61 }
 0x48d   : > { %v2595_v62 = vpop.eup %2594  ;;  %v1494_v1 = vpop.permute.xlu1 %1493  ;;  %2551 = vmatprep.subr.msk.bf16.mxu1 %vm1136_vm3, %v770_v0 }
 0x48e   : > { %v1488_v2 = vpop.permute.xlu0 %1487  ;;  %2557 = vmatprep.subr.msk.bf16.mxu0 %vm781_vm2, %v1494_v1  ;;  %v1114_v3 = vsel %vm713_vm1, %v2595_v62, 0.0  ;;  %v1505_v8 = vsel %vm781_vm2, %v1494_v1, 0 }
 0x48f   : > { %1115 = vadd.xlane.f32.xlu0 %v1114_v3  ;;  %2497 = vmatprep.mubr.msk.bf16.mxu0 %vm781_vm2, %v1488_v2 }
 0x490   : > { %v2597_v4 = vpop.eup %2596 }
 0x491   : > { %v2599_v5 = vpop.eup %2598  ;;  %v1111_v7 = vsel %vm713_vm1, %v2597_v4, 0.0  ;;  %v1490_v26 = vpop.permute.xlu1 %1489 }
 0x492   : > { %1112 = vadd.xlane.f32.xlu1 %v1111_v7  ;;  %v1108_v9 = vsel %vm713_vm1, %v2599_v5, 0.0  ;;  %v1045_v10 = vpack.c.bf16 %v2597_v4, %v2599_v5 }
 0x493   : > { %1109 = vadd.xlane.f32.xlu0 %v1108_v9  ;;  %2496 = vmatpush3.bf16.xpose.msra.mxu0 %v1505_v8 }
 0x494   : > { %2455 = vmatprep.mubr.msk.bf16.mxu1 %vm713_vm1, %v1045_v10 }
 0x495   : > { %v2601_v11 = vpop.eup %2600 }
 0x496   : > { %1317 = vmax.xlane.f32.xlu1 %v1316_v13  ;;  %v1117_v22 = vsel %vm713_vm1, %v2601_v11, 0.0  ;;  %v1046_v24 = vpack.c.bf16 %v2601_v11, %v2595_v62 }
 0x497   : > { %1118 = vadd.xlane.f32.xlu0 %v1117_v22 }
 0x498   : > { %2456 = vmatmul.mubr.msk.bf16.vlgmr.msra.gmra.mrb[8].mxu1 %vm713_vm1, %v1046_v24 }
 0x499   : > { %2460 = vmatpush3.bf16.msra.mxu1 %v1138_v63  ;;  %v1196_v63 = vsel %vm1136_vm3, %v3045_v36, 0 }
 0x49a   : > { %1323 = vmax.xlane.f32.xlu1 %v1322_v27  ;;  %2498 = vmatmul.mubr.msk.bf16.vlgmr.msra.gmra.mrb[12].mxu0 %vm781_vm2, %v1490_v26 }
 0x49b   : > { %934 = vadd.xlane.f32.xlu0 %v933_v28  ;;  %2552 = vmatprep.subr.msk.bf16.mxu1 %vm1136_vm3, %v3045_v36 }
 0x49f   : > { %940 = vadd.xlane.f32.xlu0 %v939_v30 }
 0x4a3   : > { %1320 = vmax.xlane.f32.xlu0 %v1319_v34 }
 0x4a7   : > { %1326 = vmax.xlane.f32.xlu0 %v1325_v35 }
 0x4ab   : > { %1342 = vrot.lane.b32.xlu1 %v2909_v25, %s2691_s19 }
 0x4bd   : > { %1344 = vrot.lane.b32.xlu0 %v2907_v23, %s2691_s19 }
 0x4c2   : > { %v932_v40 = vpop.xlane.xlu1 %931 }
 0x4c3   : > { %2602 = vrcp.f32 %v932_v40 }
 0x4c6   : > { %v938_v42 = vpop.xlane.xlu1 %937 }
 0x4cd   : > { %v2603_v46 = vpop.eup %2602 }
 0x4ce   : > { %v946_v48 = vmul.f32 %v2603_v46, %v2981_v19 }
 0x51c   : > { %v1116_v38 = vpop.xlane.xlu0 %1115 }
 0x51f   : > { %v1113_v56 = vpop.xlane.xlu1 %1112 }
 0x520   : > { %v1110_v39 = vpop.xlane.xlu0 %1109 }
 0x523   : > { %v1318_v58 = vpop.xlane.xlu1 %1317 }
 0x524   : > { %v1119_v41 = vpop.xlane.xlu0 %1118 }
 0x527   : > { %v1324_v19 = vpop.xlane.xlu1 %1323 }
 0x528   : > { %v935_v43 = vpop.xlane.xlu0 %934  ;;  %v1330_v60 = vsub.f32 %v3020_v12, %v1324_v19 }
 0x529   : > { %2604 = vrcp.f32 %v935_v43 }
 0x52a   : > { %2606 = vrcp.f32 %v938_v42  ;;  %v1336_v62 = vmul.f32 1.442695, %v1330_v60 }
 0x52c   : > { %v941_v45 = vpop.xlane.xlu0 %940 }
 0x52d   : > { %2608 = vrcp.f32 %v941_v45 }
 0x52e   : > { %2610 = vrcp.f32 %v1116_v38 }
 0x52f   : > { %2612 = vrcp.f32 %v1113_v56 }
 0x530   : > { %v1321_v57 = vpop.xlane.xlu0 %1320  ;;  %2614 = vrcp.f32 %v1119_v41 }
 0x531   : > { %2616 = vrcp.f32 %v1110_v39  ;;  %v1343_v39 = vpop.permute.xlu1 %1342 }
 0x533   : > { %v2605_v47 = vpop.eup %2604 }
 0x534   : > { %v947_v49 = vmul.f32 %v2605_v47, %v2985_v21  ;;  %v2607_v50 = vpop.eup %2606  ;;  %v1327_v59 = vpop.xlane.xlu0 %1326 }
 0x535   : > { %v3052_v53 = vmul.f32 %v2607_v50, %v2979_v17  ;;  %v1331_v21 = vsub.f32 %v1313_v31, %v1327_v59  ;;  %v1329_v17 = vsub.f32 %v1305_v29, %v1321_v57  ;;  %v771_v50 = vld [vmem:[%s2805_s18 + $0x8] sm:$0xf] }
 0x536   : > { %v950_v51 = vpack.c.bf16 %v947_v49, %v946_v48 }
 0x537   : > { %v2609_v52 = vpop.eup %2608  ;;  %v1338_v61 = vmul.f32 1.442695, %v1331_v21  ;;  %v1334_v1 = vmul.f32 1.442695, %v1329_v17 }
 0x538   : > { %v3055_v54 = vmul.f32 %v2609_v52, %v2983_v20  ;;  %v1328_v20 = vsub.f32 %v3013_v6, %v1318_v58  ;;  %v2611_v2 = vpop.eup %2610  ;;  %v1345_v49 = vpop.permute.xlu0 %1344 }
 0x539   : > { %2618 = vpow2.f32 %v1338_v61  ;;  %v2613_v4 = vpop.eup %2612 }
 0x53a   : > { %v951_v55 = vpack.c.bf16 %v3055_v54, %v3052_v53  ;;  %v1332_v5 = vmul.f32 1.442695, %v1328_v20  ;;  %2620 = vpow2.f32 %v1336_v62  ;;  %v2615_v8 = vpop.eup %2614 }
 0x53b   : > { %v2617_v11 = vpop.eup %2616  ;;  %2622 = vpow2.f32 %v1334_v1 }
 0x53c   : > { %2624 = vpow2.f32 %v1332_v5 }
 0x56b   : > { %v2457_v3 = vpop.f32.mrb[8].mxu1 }
 0x56c   : > { %v1093_v7 = vpop.f32.mrb[9].mxu1  ;;  %v1126_v13 = vmul.f32 %v2611_v2, %v2457_v3 }
 0x56d   : > { %v2458_v9 = vpop.f32.mrb[10].mxu1  ;;  %v2499_v10 = vpop.f32.mrb[12].mxu0  ;;  %v1124_v26 = vmul.f32 %v2617_v11, %v1093_v7 }
 0x56e   : > { %v1127_v12 = vmul.f32 %v2615_v8, %v2458_v9  ;;  %v1096_v22 = vpop.f32.mrb[11].mxu1  ;;  %v1541_v24 = vpop.f32.mrb[13].mxu0  ;;  %v1550_v31 = vadd.f32 %v2499_v10, %v2926_v32 }
 0x56f   : > { %v1125_v6 = vmul.f32 %v2613_v4, %v1096_v22  ;;  %v1542_v27 = vadd.f32 %v1541_v24, %v2931_v33  ;;  %v2500_v28 = vpop.f32.mrb[14].mxu0  ;;  %v2619_v33 = vpop.eup %2618 }
 0x570   : > { %v1129_v29 = vpack.c.bf16 %v1127_v12, %v1126_v13  ;;  %v1544_v30 = vpop.f32.mrb[15].mxu0  ;;  %v1562_v32 = vsel %vm713_vm1, %v1550_v31, -inf  ;;  %v1412_v40 = vsel %vm713_vm1, %v2619_v33, 0.0  ;;  %v1553_v43 = vadd.f32 %v2500_v28, %v2937_v37 }
 0x571   : > { %v1128_v34 = vpack.c.bf16 %v1125_v6, %v1124_v26  ;;  %v1545_v35 = vadd.f32 %v1544_v30, %v2946_v44  ;;  %v1556_v0 = vsel %vm713_vm1, %v1542_v27, -inf  ;;  %v2621_v44 = vpop.eup %2620 }
 0x572   : > { %1557 = vmax.xlane.f32.xlu1 %v1556_v0  ;;  %v2623_v36 = vpop.eup %2622  ;;  %v1409_v41 = vsel %vm713_vm1, %v2621_v44, 0.0  ;;  %v1565_v47 = vsel %vm713_vm1, %v1553_v43, -inf  ;;  %v1341_v37 = vpack.c.bf16 %v2619_v33, %v2621_v44 }
 0x573   : > { %2461 = vmatprep.mubr.msk.bf16.mxu1 %vm781_vm2, %v1128_v34  ;;  %v1559_v38 = vsel %vm713_vm1, %v1545_v35, -inf  ;;  %v2625_v42 = vpop.eup %2624  ;;  %v1406_v45 = vsel %vm713_vm1, %v2623_v36, 0.0 }
 0x574   : > { %1560 = vmax.xlane.f32.xlu0 %v1559_v38  ;;  %2462 = vmatmul.mubr.msk.bf16.vlgmr.msra.gmra.mrb[12].mxu1 %vm781_vm2, %v1129_v29  ;;  %v1403_v46 = vsel %vm713_vm1, %v2625_v42, 0.0  ;;  %v1340_v48 = vpack.c.bf16 %v2623_v36, %v2625_v42  ;;  %v772_v38 = vld [vmem:[%s2805_s18 + $0xc] sm:$0xf] }
 0x575   : > { %2466 = vmatpush3.bf16.msra.mxu1 %v1196_v63  ;;  %2467 = vmatprep.mubr.msk.bf16.mxu1 %vm781_vm2, %v950_v51  ;;  %v1432_v51 = vsel %vm1136_vm3, %v771_v50, 0  ;;  %v1672_v33 = vsel %vm1136_vm3, %v772_v38, 0 }
 0x576   : > { %2479 = vmatprep.subr.bf16.mxu1 %v1343_v39  ;;  %1563 = vmax.xlane.f32.xlu1 %v1562_v32 }
 0x578   : > { %1413 = vadd.xlane.f32.xlu0 %v1412_v40 }
 0x57a   : > { %1410 = vadd.xlane.f32.xlu1 %v1409_v41 }
 0x57c   : > { %1407 = vadd.xlane.f32.xlu0 %v1406_v45 }
 0x57e   : > { %1404 = vadd.xlane.f32.xlu1 %v1403_v46 }
 0x580   : > { %1566 = vmax.xlane.f32.xlu0 %v1565_v47  ;;  %2468 = vmatmul.mubr.msk.bf16.vlgmr.msra.gmra.mrb[12].mxu1 %vm781_vm2, %v951_v55 }
 0x581   : > { %2480 = vmatpush3.bf16.msra.mxu1 %v1343_v39  ;;  %2483 = vmatprep.mubr.msk.bf16.mxu1 %vm713_vm1, %v1340_v48 }
 0x582   : > { %2481 = vmatprep.subr.bf16.mxu1 %v1345_v49 }
 0x585   : > { %2482 = vmatpush3.bf16.msra.mxu1 %v1345_v49 }
 0x586   : > { %2555 = vmatprep.subr.msk.bf16.mxu1 %vm1136_vm3, %v771_v50 }
 0x588   : > { %2484 = vmatmul.mubr.msk.bf16.vlgmr.msra.gmra.mrb[16].mxu1 %vm713_vm1, %v1341_v37 }
 0x589   : > { %2488 = vmatpush3.bf16.msra.mxu1 %v1432_v51 }
 0x58f   : > { %1582 = vrot.lane.b32.xlu1 %v2909_v25, %s2692_s20 }
 0x596   : > { %1584 = vrot.lane.b32.xlu0 %v2907_v23, %s2692_s20  ;;  %s3253_s20 = scalar_lea.vmem %s3227_s11, %s2790_s23 }
 0x5ff   : > { %v1558_v52 = vpop.xlane.xlu1 %1557 }
 0x600   : > { %v1568_v53 = vsub.f32 %v1542_v27, %v1558_v52 }
 0x601   : > { %v1561_v54 = vpop.xlane.xlu0 %1560 }
 0x602   : > { %v1572_v55 = vmul.f32 1.442695, %v1568_v53  ;;  %v1569_v56 = vsub.f32 %v1545_v35, %v1561_v54  ;;  %v2334_v54 = vld [vmem:[%s3250_s15] ss:$0 sm:$0xff] }
 0x603   : > { %v1564_v57 = vpop.xlane.xlu1 %1563 }
 0x604   : > { %2626 = vpow2.f32 %v1572_v55  ;;  %v1574_v58 = vmul.f32 1.442695, %v1569_v56  ;;  %v1570_v59 = vsub.f32 %v1550_v31, %v1564_v57 }
 0x605   : > { %v1414_v19 = vpop.xlane.xlu0 %1413 }
 0x606   : > { %2628 = vpow2.f32 %v1574_v58  ;;  %v1576_v21 = vmul.f32 1.442695, %v1570_v59 }
 0x607   : > { %v1411_v25 = vpop.xlane.xlu1 %1410 }
 0x608   : > { %2630 = vpow2.f32 %v1576_v21 }
 0x609   : > { %v1408_v60 = vpop.xlane.xlu0 %1407 }
 0x60b   : > { %v1405_v17 = vpop.xlane.xlu1 %1404 }
 0x60d   : > { %v1567_v61 = vpop.xlane.xlu0 %1566 }
 0x60e   : > { %v2627_v20 = vpop.eup %2626  ;;  %v1571_v62 = vsub.f32 %v1553_v43, %v1567_v61 }
 0x60f   : > { %v1583_v23 = vpop.permute.xlu1 %1582  ;;  %v1643_v1 = vsel %vm713_vm1, %v2627_v20, 0.0 }
 0x610   : > { %v2629_v2 = vpop.eup %2628  ;;  %v1578_v3 = vmul.f32 1.442695, %v1571_v62  ;;  %1644 = vadd.xlane.f32.xlu1 %v1643_v1  ;;  %2501 = vmatprep.subr.bf16.mxu1 %v1583_v23 }
 0x611   : > { %v1646_v4 = vsel %vm713_vm1, %v2629_v2, 0.0  ;;  %v1580_v5 = vpack.c.bf16 %v2629_v2, %v2627_v20  ;;  %v1585_v63 = vpop.permute.xlu0 %1584 }
 0x612   : > { %v2631_v7 = vpop.eup %2630  ;;  %2632 = vpow2.f32 %v1578_v3  ;;  %1647 = vadd.xlane.f32.xlu0 %v1646_v4 }
 0x613   : > { %v1649_v8 = vsel %vm713_vm1, %v2631_v7, 0.0  ;;  %2634 = vrcp.f32 %v1411_v25 }
 0x614   : > { %1650 = vadd.xlane.f32.xlu1 %v1649_v8  ;;  %2636 = vrcp.f32 %v1405_v17 }
 0x615   : > { %2638 = vrcp.f32 %v1414_v19 }
 0x616   : > { %2640 = vrcp.f32 %v1408_v60 }
 0x61c   : > { %v2633_v9 = vpop.eup %2632 }
 0x61d   : > { %v1652_v10 = vsel %vm713_vm1, %v2633_v9, 0.0  ;;  %v1581_v11 = vpack.c.bf16 %v2633_v9, %v2631_v7  ;;  %v2635_v13 = vpop.eup %2634 }
 0x61e   : > { %1653 = vadd.xlane.f32.xlu0 %v1652_v10  ;;  %v2637_v22 = vpop.eup %2636 }
 0x61f   : > { %v2639_v6 = vpop.eup %2638 }
 0x620   : > { %v2641_v29 = vpop.eup %2640 }
 0x65b   : > { %v2485_v12 = vpop.f32.mrb[16].mxu1 }
 0x65c   : > { %v1421_v24 = vmul.f32 %v2635_v13, %v2485_v12  ;;  %v1388_v26 = vpop.f32.mrb[17].mxu1 }
 0x65d   : > { %v1419_v27 = vmul.f32 %v2637_v22, %v1388_v26  ;;  %v2486_v28 = vpop.f32.mrb[18].mxu1 }
 0x65e   : > { %v1422_v30 = vmul.f32 %v2639_v6, %v2486_v28  ;;  %v1391_v31 = vpop.f32.mrb[19].mxu1 }
 0x65f   : > { %v1420_v34 = vmul.f32 %v2641_v29, %v1391_v31  ;;  %v2580_v29 = vld [vmem:[%s2818_s27] sm:$0xff]  }
 0x660   : > { %v1424_v35 = vpack.c.bf16 %v1422_v30, %v1421_v24  ;;  %2515 = vmatprep.subr.bf16.mxu0 %v2580_v29  ;;  %v2581_v30 = vld [vmem:[%s2818_s27 + $0x8] sm:$0xff]   ;;  %v2582_v31 = vld [vmem:[%s2832_s21] sm:$0xff]  }
 0x661   : > { %v1423_v0 = vpack.c.bf16 %v1420_v34, %v1419_v27  ;;  %2516 = vmatpush3.bf16.msra.mxu0 %v2580_v29 }
 0x662   : > { %2517 = vmatprep.subr.bf16.mxu0 %v2581_v30 }
 0x663   : > { %2489 = vmatprep.mubr.msk.bf16.mxu1 %vm781_vm2, %v1423_v0 }
 0x664   : > { %2490 = vmatmul.mubr.msk.bf16.vlgmr.msra.gmra.mrb[12].mxu1 %vm781_vm2, %v1424_v35 }
 0x665   : > { %2502 = vmatpush3.bf16.msra.mxu1 %v1583_v23  ;;  %2505 = vmatprep.mubr.msk.bf16.mxu1 %vm713_vm1, %v1580_v5 }
 0x666   : > { %2503 = vmatprep.subr.bf16.mxu1 %v1585_v63  ;;  %2518 = vmatpush3.bf16.msra.mxu0 %v2581_v30 }
 0x667   : > { %2523 = vmatprep.subr.bf16.mxu0 %v2582_v31 }
 0x669   : > { %2504 = vmatpush3.bf16.msra.mxu1 %v1585_v63 }
 0x66a   : > { %2558 = vmatprep.subr.msk.bf16.mxu1 %vm1136_vm3, %v772_v38 }
 0x66c   : > { %2506 = vmatmul.mubr.msk.bf16.vlgmr.msra.gmra.mrb[20].mxu1 %vm713_vm1, %v1581_v11 }
 0x66d   : > { %2510 = vmatpush3.bf16.msra.mxu1 %v1672_v33 }
 0x69d   : > { %v1645_v39 = vpop.xlane.xlu1 %1644 }
 0x69e   : > { %2642 = vrcp.f32 %v1645_v39 }
 0x69f   : > { %v1648_v32 = vpop.xlane.xlu0 %1647 }
 0x6a1   : > { %v1651_v44 = vpop.xlane.xlu1 %1650 }
 0x6a2   : > { %2644 = vrcp.f32 %v1651_v44 }
 0x6a8   : > { %v2643_v36 = vpop.eup %2642 }
 0x6ab   : > { %v1654_v40 = vpop.xlane.xlu0 %1653 }
 0x6ac   : > { %2646 = vrcp.f32 %v1654_v40  ;;  %v2645_v42 = vpop.eup %2644 }
 0x6ad   : > { %2648 = vrcp.f32 %v1648_v32 }
 0x6b6   : > { %v2647_v45 = vpop.eup %2646 }
 0x6b7   : > { %v2649_v47 = vpop.eup %2648 }
 0x73f   : > { %v2507_v41 = vpop.f32.mrb[20].mxu1 }
 0x740   : > { %v1628_v43 = vpop.f32.mrb[21].mxu1  ;;  %v1661_v48 = vmul.f32 %v2645_v42, %v2507_v41 }
 0x741   : > { %v2508_v46 = vpop.f32.mrb[22].mxu1  ;;  %v1659_v50 = vmul.f32 %v2643_v36, %v1628_v43  ;;  %v2335_v43 = vld [vmem:[%s3251_s26] ss:$0 sm:$0xff] }
 0x742   : > { %v1662_v49 = vmul.f32 %v2647_v45, %v2508_v46  ;;  %v1631_v37 = vpop.f32.mrb[23].mxu1 }
 0x743   : > { %v1660_v51 = vmul.f32 %v2649_v47, %v1631_v37  ;;  %v2336_v37 = vld [vmem:[%s3252_s17] ss:$0 sm:$0xff] }
 0x744   : > { %v1664_v52 = vpack.c.bf16 %v1662_v49, %v1661_v48 }
 0x745   : > { %v1663_v53 = vpack.c.bf16 %v1660_v51, %v1659_v50 }
 0x747   : > { %2511 = vmatprep.mubr.msk.bf16.mxu1 %vm781_vm2, %v1663_v53 }
 0x748   : > { %2512 = vmatmul.mubr.msk.bf16.vlgmr.msra.gmra.mrb[12].mxu1 %vm781_vm2, %v1664_v52 }
 0x81b   : > { %v2513_v55 = vpop.f32.mrb[12].mxu1 }
 0x81c   : > { %v1708_v56 = vpop.f32.mrb[13].mxu1  ;;  %v1736_v57 = vadd.f32 %v2513_v55, %v2334_v54 }
 0x81d   : > { %v1734_v58 = vadd.f32 %v2334_v54, %v1708_v56  ;;  %v2514_v59 = vpop.f32.mrb[14].mxu1 }
 0x81e   : > { %v1711_v19 = vpop.f32.mrb[15].mxu1  ;;  %v1737_v21 = vadd.f32 %v2514_v59, %v2334_v54  ;;  %v1740_v20 = vadd.f32 %v1736_v57, %v2894_v16 }
 0x81f   : > { %v1735_v25 = vadd.f32 %v2334_v54, %v1711_v19  ;;  %v1738_v60 = vadd.f32 %v1734_v58, %v2884_v14 }
 0x820   : > { %v1741_v23 = vadd.f32 %v1737_v21, %v2901_v18  ;;  %v1750_v1 = vsel %vm713_vm1, %v1740_v20, 0.0 }
 0x821   : > { %v1744_v17 = vsel %vm713_vm1, %v1738_v60, 0.0  ;;  %v1739_v61 = vadd.f32 %v1735_v25, %v2889_v15  ;;  %v2583_v25 = vld [vmem:[%s2832_s21 + $0x8] sm:$0xff]  }
 0x822   : > { %1745 = vadd.xlane.f32.xlu1 %v1744_v17  ;;  %v1753_v2 = vsel %vm713_vm1, %v1741_v23, 0.0  ;;  %v2585_v17 = vld [vmem:[%s2832_s21 + $0x18] sm:$0xff]  }
 0x823   : > { %v1747_v62 = vsel %vm713_vm1, %v1739_v61, 0.0 }
 0x824   : > { %1748 = vadd.xlane.f32.xlu0 %v1747_v62 }
 0x826   : > { %1751 = vadd.xlane.f32.xlu1 %v1750_v1 }
 0x828   : > { %1754 = vadd.xlane.f32.xlu0 %v1753_v2 }
 0x8af   : > { %v1746_v3 = vpop.xlane.xlu1 %1745 }
 0x8b0   : > { %v1757_v14 = vmul.f32 0.03125, %v1746_v3 }
 0x8b1   : > { %v1749_v4 = vpop.xlane.xlu0 %1748 }
 0x8b2   : > { %v1761_v5 = vsub.f32 %v1738_v60, %v1757_v14  ;;  %v1758_v7 = vmul.f32 0.03125, %v1749_v4  ;;  %v2584_v60 = vld [vmem:[%s2832_s21 + $0x10] sm:$0xff]  }
 0x8b3   : > { %v1752_v15 = vpop.xlane.xlu1 %1751 }
 0x8b4   : > { %v1762_v8 = vsub.f32 %v1739_v61, %v1758_v7  ;;  %v1759_v16 = vmul.f32 0.03125, %v1752_v15  ;;  %v1765_v9 = vmul.f32 %v1761_v5, %v1761_v5  ;;  %v2337_v61 = vld [vmem:[%s650_s3] ss:$0 sm:$0xff] }
 0x8b5   : > { %v1755_v10 = vpop.xlane.xlu0 %1754 }
 0x8b6   : > { %v1763_v11 = vsub.f32 %v1740_v20, %v1759_v16  ;;  %v1760_v18 = vmul.f32 0.03125, %v1755_v10  ;;  %v1769_v13 = vsel %vm713_vm1, %v1765_v9, 0.0  ;;  %v1766_v12 = vmul.f32 %v1762_v8, %v1762_v8  ;;  %v2342_v10 = vld [vmem:[%s3253_s20] ss:$0 sm:$0xff] }
 0x8b7   : > { %1770 = vadd.xlane.f32.xlu1 %v1769_v13 }
 0x8b8   : > { %v1764_v22 = vsub.f32 %v1741_v23, %v1760_v18  ;;  %v1772_v24 = vsel %vm713_vm1, %v1766_v12, 0.0  ;;  %v1767_v26 = vmul.f32 %v1763_v11, %v1763_v11 }
 0x8b9   : > { %1773 = vadd.xlane.f32.xlu0 %v1772_v24 }
 0x8ba   : > { %v1775_v6 = vsel %vm713_vm1, %v1767_v26, 0.0  ;;  %v1768_v27 = vmul.f32 %v1764_v22, %v1764_v22 }
 0x8bb   : > { %1776 = vadd.xlane.f32.xlu1 %v1775_v6 }
 0x8bc   : > { %v1778_v28 = vsel %vm713_vm1, %v1768_v27, 0.0 }
 0x8bd   : > { %1779 = vadd.xlane.f32.xlu0 %v1778_v28 }
 0x944   : > { %v1771_v34 = vpop.xlane.xlu1 %1770 }
 0x945   : > { %v1781_v35 = vmul.f32 0.03125, %v1771_v34 }
 0x946   : > { %v1774_v0 = vpop.xlane.xlu0 %1773 }
 0x947   : > { %v1785_v63 = vadd.f32 1e-05, %v1781_v35  ;;  %v1782_v38 = vmul.f32 0.03125, %v1774_v0 }
 0x948   : > { %v1777_v33 = vpop.xlane.xlu1 %1776 }
 0x949   : > { %2650 = vrsqrt.f32 %v1785_v63  ;;  %v1786_v39 = vadd.f32 1e-05, %v1782_v38  ;;  %v1783_v32 = vmul.f32 0.03125, %v1777_v33 }
 0x94a   : > { %v1780_v44 = vpop.xlane.xlu0 %1779 }
 0x94b   : > { %2652 = vrsqrt.f32 %v1786_v39  ;;  %v1787_v40 = vadd.f32 1e-05, %v1783_v32  ;;  %v1784_v36 = vmul.f32 0.03125, %v1780_v44 }
 0x94d   : > { %2654 = vrsqrt.f32 %v1787_v40  ;;  %v1788_v41 = vadd.f32 1e-05, %v1784_v36 }
 0x94f   : > { %2656 = vrsqrt.f32 %v1788_v41 }
 0x953   : > { %v2651_v42 = vpop.eup %2650 }
 0x954   : > { %v1793_v45 = vmul.f32 %v2651_v42, %v1761_v5 }
 0x955   : > { %v2653_v46 = vpop.eup %2652 }
 0x956   : > { %v1794_v47 = vmul.f32 %v2653_v46, %v1762_v8  ;;  %v1803_v48 = vmul.f32 %v2335_v43, %v1793_v45 }
 0x957   : > { %v2655_v49 = vpop.eup %2654 }
 0x958   : > { %v1795_v50 = vmul.f32 %v2655_v49, %v1763_v11  ;;  %v1804_v51 = vmul.f32 %v2335_v43, %v1794_v47  ;;  %v1813_v55 = vadd.f32 %v2336_v37, %v1803_v48 }
 0x959   : > { %v2657_v52 = vpop.eup %2656 }
 0x95a   : > { %v1805_v53 = vmul.f32 %v2335_v43, %v1795_v50  ;;  %v1796_v54 = vmul.f32 %v2657_v52, %v1764_v22  ;;  %v1814_v56 = vadd.f32 %v2336_v37, %v1804_v51 }
 0x95c   : > { %v1806_v57 = vmul.f32 %v2335_v43, %v1796_v54  ;;  %v1817_v58 = vpack.c.bf16 %v1814_v56, %v1813_v55  ;;  %v1815_v59 = vadd.f32 %v2336_v37, %v1805_v53 }
 0x95e   : > { %2519 = vmatprep.mubr.msk.bf16.mxu0 %vm713_vm1, %v1817_v58  ;;  %v1816_v19 = vadd.f32 %v2336_v37, %v1806_v57 }
 0x960   : > { %v1818_v21 = vpack.c.bf16 %v1816_v19, %v1815_v59 }
 0x962   : > { %2520 = vmatmul.mubr.msk.bf16.vlgmr.msra.gmra.mrb[16].mxu0 %vm713_vm1, %v1818_v21 }
 0x963   : > { %2524 = vmatpush3.bf16.msra.mxu0 %v2582_v31 }
 0x964   : > { %2525 = vmatprep.subr.bf16.mxu0 %v2583_v25 }
 0x967   : > { %2526 = vmatpush3.bf16.msra.mxu0 %v2583_v25 }
 0x968   : > { %2527 = vmatprep.subr.bf16.mxu0 %v2584_v60 }
 0x96b   : > { %2528 = vmatpush3.bf16.msra.mxu0 %v2584_v60 }
 0x96c   : > { %2529 = vmatprep.subr.bf16.mxu0 %v2585_v17 }
 0x96f   : > { %2530 = vmatpush3.bf16.msra.mxu0 %v2585_v17 }
 0xa35   : > { %v2521_v20 = vpop.f32.mrb[16].mxu0 }
 0xa36   : > { %v1891_v62 = vadd.f32 %v2521_v20, %v2337_v61  ;;  %v1882_v23 = vpop.f32.mrb[17].mxu0  ;;  %v2349_v20 = vld [vmem:[%s661_s25] ss:$0 sm:$0xff] }
 0xa37   : > { %v1883_v1 = vadd.f32 %v2337_v61, %v1882_v23  ;;  %v2522_v2 = vpop.f32.mrb[18].mxu0 }
 0xa38   : > { %v1894_v3 = vadd.f32 %v2522_v2, %v2337_v61  ;;  %v1885_v14 = vpop.f32.mrb[19].mxu0  ;;  %v1899_v5 = vmax.f32 %v1891_v62, 0.0 }
 0xa39   : > { %v1886_v4 = vadd.f32 %v2337_v61, %v1885_v14  ;;  %v1897_v15 = vmax.f32 %v1883_v1, 0.0  ;;  %v2350_v1 = vld [vmem:[%s664_s2] ss:$0 sm:$0xff] }
 0xa3a   : > { %v1900_v7 = vmax.f32 %v1894_v3, 0.0 }
 0xa3b   : > { %v1898_v8 = vmax.f32 %v1886_v4, 0.0 }
 0xa3c   : > { %v1902_v16 = vpack.c.bf16 %v1900_v7, %v1899_v5 }
 0xa3d   : > { %v1901_v9 = vpack.c.bf16 %v1898_v8, %v1897_v15 }
 0xa3f   : > { %2531 = vmatprep.mubr.msk.bf16.mxu0 %vm1942_vm4, %v1901_v9 }
 0xa40   : > { %2532 = vmatmul.mubr.msk.bf16.vlgmr.msra.gmra.mrb[20].mxu0 %vm1942_vm4, %v1902_v16 }
 0xb13   : > { %v2533_v11 = vpop.f32.mrb[20].mxu0 }
 0xb14   : > { %v1983_v18 = vpop.f32.mrb[21].mxu0  ;;  %v1992_v13 = vadd.f32 %v2533_v11, %v2342_v10 }
 0xb15   : > { %v1984_v12 = vadd.f32 %v2342_v10, %v1983_v18  ;;  %v2534_v22 = vpop.f32.mrb[22].mxu0 }
 0xb16   : > { %v1986_v24 = vpop.f32.mrb[23].mxu0  ;;  %v1995_v26 = vadd.f32 %v2534_v22, %v2342_v10  ;;  %v2000_v30 = vadd.f32 %v1992_v13, %v1815_v59 }
 0xb17   : > { %v1987_v6 = vadd.f32 %v2342_v10, %v1986_v24  ;;  %v1998_v27 = vadd.f32 %v1984_v12, %v1813_v55 }
 0xb18   : > { %v2001_v34 = vadd.f32 %v1995_v26, %v1816_v19  ;;  %v2010_v35 = vsel %vm713_vm1, %v2000_v30, 0.0 }
 0xb19   : > { %v2004_v28 = vsel %vm713_vm1, %v1998_v27, 0.0  ;;  %v1999_v29 = vadd.f32 %v1987_v6, %v1814_v56 }
 0xb1a   : > { %2005 = vadd.xlane.f32.xlu1 %v2004_v28  ;;  %v2013_v0 = vsel %vm713_vm1, %v2001_v34, 0.0 }
 0xb1b   : > { %v2007_v31 = vsel %vm713_vm1, %v1999_v29, 0.0 }
 0xb1c   : > { %2008 = vadd.xlane.f32.xlu0 %v2007_v31 }
 0xb1e   : > { %2011 = vadd.xlane.f32.xlu1 %v2010_v35 }
 0xb20   : > { %2014 = vadd.xlane.f32.xlu0 %v2013_v0 }
 0xba7   : > { %v2006_v63 = vpop.xlane.xlu1 %2005 }
 0xba8   : > { %v2016_v38 = vmul.f32 0.03125, %v2006_v63 }
 0xba9   : > { %v2009_v33 = vpop.xlane.xlu0 %2008 }
 0xbaa   : > { %v2020_v39 = vsub.f32 %v1998_v27, %v2016_v38  ;;  %v2017_v32 = vmul.f32 0.03125, %v2009_v33 }
 0xbab   : > { %v2012_v44 = vpop.xlane.xlu1 %2011 }
 0xbac   : > { %v2021_v40 = vsub.f32 %v1999_v29, %v2017_v32  ;;  %v2018_v36 = vmul.f32 0.03125, %v2012_v44  ;;  %v2024_v41 = vmul.f32 %v2020_v39, %v2020_v39 }
 0xbad   : > { %v2015_v42 = vpop.xlane.xlu0 %2014 }
 0xbae   : > { %v2022_v43 = vsub.f32 %v2000_v30, %v2018_v36  ;;  %v2019_v45 = vmul.f32 0.03125, %v2015_v42  ;;  %v2028_v46 = vsel %vm713_vm1, %v2024_v41, 0.0  ;;  %v2025_v47 = vmul.f32 %v2021_v40, %v2021_v40 }
 0xbaf   : > { %2029 = vadd.xlane.f32.xlu1 %v2028_v46 }
 0xbb0   : > { %v2023_v48 = vsub.f32 %v2001_v34, %v2019_v45  ;;  %v2031_v49 = vsel %vm713_vm1, %v2025_v47, 0.0  ;;  %v2026_v37 = vmul.f32 %v2022_v43, %v2022_v43 }
 0xbb1   : > { %2032 = vadd.xlane.f32.xlu0 %v2031_v49 }
 0xbb2   : > { %v2034_v50 = vsel %vm713_vm1, %v2026_v37, 0.0  ;;  %v2027_v51 = vmul.f32 %v2023_v48, %v2023_v48 }
 0xbb3   : > { %2035 = vadd.xlane.f32.xlu1 %v2034_v50 }
 0xbb4   : > { %v2037_v52 = vsel %vm713_vm1, %v2027_v51, 0.0 }
 0xbb5   : > { %2038 = vadd.xlane.f32.xlu0 %v2037_v52 }
 0xc3c   : > { %v2030_v53 = vpop.xlane.xlu1 %2029 }
 0xc3d   : > { %v2040_v54 = vmul.f32 0.03125, %v2030_v53 }
 0xc3e   : > { %v2033_v55 = vpop.xlane.xlu0 %2032 }
 0xc3f   : > { %v2044_v56 = vadd.f32 1e-05, %v2040_v54  ;;  %v2041_v57 = vmul.f32 0.03125, %v2033_v55 }
 0xc40   : > { %v2036_v58 = vpop.xlane.xlu1 %2035 }
 0xc41   : > { %2658 = vrsqrt.f32 %v2044_v56  ;;  %v2045_v59 = vadd.f32 1e-05, %v2041_v57  ;;  %v2042_v19 = vmul.f32 0.03125, %v2036_v58 }
 0xc42   : > { %v2039_v21 = vpop.xlane.xlu0 %2038 }
 0xc43   : > { %2660 = vrsqrt.f32 %v2045_v59  ;;  %v2046_v25 = vadd.f32 1e-05, %v2042_v19  ;;  %v2043_v60 = vmul.f32 0.03125, %v2039_v21 }
 0xc45   : > { %2662 = vrsqrt.f32 %v2046_v25  ;;  %v2047_v17 = vadd.f32 1e-05, %v2043_v60 }
 0xc47   : > { %2664 = vrsqrt.f32 %v2047_v17 }
 0xc4b   : > { %v2659_v61 = vpop.eup %2658 }
 0xc4c   : > { %v2052_v62 = vmul.f32 %v2659_v61, %v2020_v39 }
 0xc4d   : > { %v2661_v23 = vpop.eup %2660 }
 0xc4e   : > { %v2062_v2 = vmul.f32 %v2349_v20, %v2052_v62  ;;  %v2053_v3 = vmul.f32 %v2661_v23, %v2021_v40 }
 0xc4f   : > { %v2663_v14 = vpop.eup %2662 }
 0xc50   : > { %v2072_v4 = vadd.f32 %v2350_v1, %v2062_v2  ;;  %v2063_v5 = vmul.f32 %v2349_v20, %v2053_v3  ;;  %v2054_v7 = vmul.f32 %v2663_v14, %v2022_v43  ;;  %2079 = sbr.rel (%p2351_p5) target bundleno = 3161 (0xc59), region = 92 }
 0xc51   : > { %v2665_v15 = vpop.eup %2664 }
 0xc52   : > { %v2073_v8 = vadd.f32 %v2350_v1, %v2063_v5  ;;  %v2064_v16 = vmul.f32 %v2349_v20, %v2054_v7  ;;  %v2055_v9 = vmul.f32 %v2665_v15, %v2023_v48  ;;  %2080 = vst.msk [vmem:[%s3232_s16] sm:$0xff] (!%p2351_p5), %vm713_vm1, %v2072_v4 }
 0xc54   : > { %v2074_v10 = vadd.f32 %v2350_v1, %v2064_v16  ;;  %v2065_v11 = vmul.f32 %v2349_v20, %v2055_v9  ;;  %2081 = vst.msk [vmem:[%s3232_s16 + $0x8] sm:$0xff] (!%p2351_p5), %vm713_vm1, %v2073_v8 }
 0xc56   : > { %v2075_v18 = vadd.f32 %v2350_v1, %v2065_v11  ;;  %2082 = vst.msk [vmem:[%s3232_s16 + $0x10] sm:$0xff] (!%p2351_p5), %vm713_vm1, %v2074_v10 }
 0xc58   : > { %2083 = vst.msk [vmem:[%s3232_s16 + $0x18] sm:$0xff] %vm713_vm1, %v2075_v18 }
 0xc59 PF: > { %p2352_p6 = scmp.ne.s32.totalorder %s2784_s22, 1 }
 0xc5a   : > { %v2090_v13 = vsel (!%p2352_p6), %vm713_vm1, %v2072_v4, 0.0  ;;  %v2096_v12 = vsel (!%p2352_p6), %vm713_vm1, %v2074_v10, 0.0  ;;  %v2093_v22 = vsel (!%p2352_p6), %vm713_vm1, %v2073_v8, 0.0  ;;  %v2099_v24 = vsel (!%p2352_p6), %vm713_vm1, %v2075_v18, 0.0  ;;  %s3254_s0 = sld [smem:[#allocation8_spill]] (!%p2352_p6)  ;;  %s3255_s3 = sld [smem:[#allocation9_spill]] (!%p2352_p6) }
 0xc5b   : > { %2087 = sbr.rel (%p2352_p6) target bundleno = 3484 (0xd9c), region = 96  ;;  %2091 = vadd.xlane.f32.xlu0 (!%p2352_p6), %v2090_v13  ;;  %2097 = vadd.xlane.f32.xlu1 (!%p2352_p6), %v2096_v12 }
 0xc5f   : > { %2094 = vadd.xlane.f32.xlu0 (!%p2352_p6), %v2093_v22  ;;  %2100 = vadd.xlane.f32.xlu1 (!%p2352_p6), %v2099_v24 }
 0xc60   : > { %v2353_v56 = vld [vmem:[%s3254_s0] ss:$0 sm:$0xff] (!%p2352_p6) }
 0xc61   : > { %v2354_v58 = vld [vmem:[%s3255_s3] ss:$0 sm:$0xff] (!%p2352_p6) }
 0xce8   : > { %v2092_v26 = vpop.xlane.xlu0 %2091  ;;  %v2098_v6 = vpop.xlane.xlu1 %2097 }
 0xce9   : > { %v2102_v27 = vmul.f32 0.03125, %v2092_v26  ;;  %v2104_v28 = vmul.f32 0.03125, %v2098_v6 }
 0xceb   : > { %v2106_v29 = vsub.f32 %v2072_v4, %v2102_v27  ;;  %v2108_v30 = vsub.f32 %v2074_v10, %v2104_v28 }
 0xcec   : > { %v2095_v31 = vpop.xlane.xlu0 %2094  ;;  %v2101_v34 = vpop.xlane.xlu1 %2100 }
 0xced   : > { %v2103_v35 = vmul.f32 0.03125, %v2095_v31  ;;  %v2105_v0 = vmul.f32 0.03125, %v2101_v34  ;;  %v2110_v63 = vmul.f32 %v2106_v29, %v2106_v29  ;;  %v2112_v38 = vmul.f32 %v2108_v30, %v2108_v30 }
 0xcef   : > { %v2107_v33 = vsub.f32 %v2073_v8, %v2103_v35  ;;  %v2109_v39 = vsub.f32 %v2075_v18, %v2105_v0  ;;  %v2114_v32 = vsel %vm713_vm1, %v2110_v63, 0.0  ;;  %v2120_v44 = vsel %vm713_vm1, %v2112_v38, 0.0 }
 0xcf0   : > { %2115 = vadd.xlane.f32.xlu0 %v2114_v32 }
 0xcf1   : > { %v2111_v40 = vmul.f32 %v2107_v33, %v2107_v33  ;;  %v2113_v36 = vmul.f32 %v2109_v39, %v2109_v39 }
 0xcf3   : > { %v2117_v41 = vsel %vm713_vm1, %v2111_v40, 0.0  ;;  %v2123_v42 = vsel %vm713_vm1, %v2113_v36, 0.0 }
 0xcf4   : > { %2121 = vadd.xlane.f32.xlu0 %v2120_v44  ;;  %2118 = vadd.xlane.f32.xlu1 %v2117_v41 }
 0xcf8   : > { %2124 = vadd.xlane.f32.xlu1 %v2123_v42 }
 0xd7d   : > { %v2116_v43 = vpop.xlane.xlu0 %2115 }
 0xd7e   : > { %v2126_v45 = vmul.f32 0.03125, %v2116_v43 }
 0xd80   : > { %v2130_v46 = vadd.f32 1e-05, %v2126_v45 }
 0xd81   : > { %v2119_v47 = vpop.xlane.xlu1 %2118  ;;  %v2122_v48 = vpop.xlane.xlu0 %2121 }
 0xd82   : > { %2666 = vrsqrt.f32 %v2130_v46  ;;  %v2127_v49 = vmul.f32 0.03125, %v2119_v47  ;;  %v2128_v37 = vmul.f32 0.03125, %v2122_v48 }
 0xd84   : > { %v2131_v50 = vadd.f32 1e-05, %v2127_v49  ;;  %v2132_v51 = vadd.f32 1e-05, %v2128_v37 }
 0xd85   : > { %v2125_v52 = vpop.xlane.xlu1 %2124 }
 0xd86   : > { %2668 = vrsqrt.f32 %v2131_v50  ;;  %v2129_v53 = vmul.f32 0.03125, %v2125_v52 }
 0xd87   : > { %2670 = vrsqrt.f32 %v2132_v51 }
 0xd88   : > { %v2133_v54 = vadd.f32 1e-05, %v2129_v53 }
 0xd8a   : > { %2672 = vrsqrt.f32 %v2133_v54 }
 0xd8c   : > { %v2667_v55 = vpop.eup %2666 }
 0xd8d   : > { %v2138_v57 = vmul.f32 %v2667_v55, %v2106_v29 }
 0xd8f   : > { %v2148_v59 = vmul.f32 %v2353_v56, %v2138_v57 }
 0xd90   : > { %v2669_v19 = vpop.eup %2668 }
 0xd91   : > { %v2671_v21 = vpop.eup %2670  ;;  %v2158_v25 = vadd.f32 %v2354_v58, %v2148_v59  ;;  %v2139_v60 = vmul.f32 %v2669_v19, %v2107_v33 }
 0xd92   : > { %v2140_v17 = vmul.f32 %v2671_v21, %v2108_v30 }
 0xd93   : > { %2162 = vst.msk [vmem:[%s3232_s16] sm:$0xff] %vm713_vm1, %v2158_v25  ;;  %v2149_v61 = vmul.f32 %v2353_v56, %v2139_v60 }
 0xd94   : > { %v2673_v20 = vpop.eup %2672  ;;  %v2150_v62 = vmul.f32 %v2353_v56, %v2140_v17 }
 0xd95   : > { %v2159_v23 = vadd.f32 %v2354_v58, %v2149_v61  ;;  %v2141_v1 = vmul.f32 %v2673_v20, %v2109_v39 }
 0xd96   : > { %v2160_v2 = vadd.f32 %v2354_v58, %v2150_v62 }
 0xd97   : > { %2163 = vst.msk [vmem:[%s3232_s16 + $0x8] sm:$0xff] %vm713_vm1, %v2159_v23  ;;  %v2151_v3 = vmul.f32 %v2353_v56, %v2141_v1 }
 0xd98   : > { %2164 = vst.msk [vmem:[%s3232_s16 + $0x10] sm:$0xff] %vm713_vm1, %v2160_v2 }
 0xd99   : > { %v2161_v14 = vadd.f32 %v2354_v58, %v2151_v3 }
 0xd9b   : > { %2165 = vst.msk [vmem:[%s3232_s16 + $0x18] sm:$0xff] %vm713_vm1, %v2161_v14 }
 0xd9c PF: > { %s3256_s27 = sld [smem:[#allocation2_spill]] }
 0xda2   : > { %s26_s21 = sadd.s32 1, %s3256_s27  }
 0xda3   : > { %p23_p7 = scmp.ge.s32.totalorder %s26_s21, 4  }
 0xda5   :  { %25 = sbr.rel (!%p23_p7) target bundleno = 8 (0x8), region = 152 }

</bundles_post_ra>
